<compile_context>
chip_gen: v7x
topology: tpu7x:2x2x1
jax: 0.10.0
libtpu: 0.0.40
codegen_flags: <defaults>
</compile_context>

<pallas_src>
import functools

import jax
import jax.numpy as jnp
from jax.experimental import pallas as pl
from jax.experimental.pallas import tpu as pltpu


# ------------------------------ Pallas kernel ------------------------------ #

def _sf2f_fused_kernel(x_ref, w_ref, shift_ref, bias_ref, seq_ref, emb_ref, *,
                       normalize):
    """Whole SF2FEncoder forward for a block of TB batch elements.

    x_ref:     (TB, L0, C_pad)             input, channels zero-padded to C_pad
    w_ref:     (n_layers, 3*C_pad, C_pad)  packed taps [prev|center|next],
                                           BN scale folded in, matmul dtype
    shift_ref: (n_layers-1, 1, C_pad)      folded BN shift (0 on padded lanes)
    bias_ref:  (1, 1, C_pad)               last-layer bias (0 on padded lanes)
    seq_ref:   (TB, L_f, C_pad)            final sequence output (NLC layout)
    emb_ref:   (TB, 1, C_pad)              pooled (+ normalized) embedding
    """
    TB, L0, c_pad = x_ref.shape
    n_layers = w_ref.shape[0]
    mm_dtype = w_ref.dtype               # bf16 by default (f32 accumulation)
    M = TB * L0

    # Row-within-batch-element index, hoisted once and reused by every layer's
    # edge zero-fill mask.
    row = jax.lax.broadcasted_iota(jnp.int32, (TB, L0, c_pad), 1).reshape(M, c_pad)

    # Flatten the whole block to one lane-dense (M, C_pad) activation slab.
    x = x_ref[...].reshape(M, c_pad)     # f32
    stride = 1                           # valid rows sit at multiples of stride
    for li in range(n_layers):
        # Row shifts by +-stride: XLU roll + VPU edge mask (padding=1 zeros).
        # Cross-batch-element leakage of the flat roll lands only on the
        # masked edge rows, so it is zeroed out exactly.
        x_prev = jnp.where(row >= stride,
                           pltpu.roll(x, stride, axis=0), 0.0)      # x[r - s]
        x_next = jnp.where(row < L0 - stride,
                           pltpu.roll(x, M - stride, axis=0), 0.0)  # x[r + s]

        # All 3 taps fused into one K=3*C_pad matmul; one cast of the operand.
        x_cat = jnp.concatenate([x_prev, x, x_next], axis=-1).astype(mm_dtype)
        y = jnp.dot(x_cat, w_ref[li], preferred_element_type=jnp.float32)

        if li < n_layers - 1:
            # BN scale already folded into the weights; eval-mode shift + ReLU.
            y = jnp.maximum(y + shift_ref[li], 0.0)
        else:
            y = y + bias_ref[0]          # last conv has a bias, no BN/ReLU
        x = y
        stride *= 2                      # output valid rows twice as sparse
        # TODO(synk): for production-length sequences, compact valid rows every
        # layer (sublane de-interleave) once the MXU becomes the binding unit.

    # Strided gather of the valid rows (row-stride == 2**n_layers).
    n_out = L0 // stride
    seq = x.reshape(TB * n_out, stride, c_pad)[:, 0, :].reshape(TB, n_out, c_pad)
    seq_ref[...] = seq

    # Fused epilogue: global average pool over time + optional L2 normalize.
    emb = jnp.sum(seq, axis=1, keepdims=True) * (1.0 / n_out)       # (TB,1,C)
    if normalize:
        nrm = jnp.sqrt(jnp.sum(emb * emb, axis=-1, keepdims=True))
        emb = emb / jnp.maximum(nrm, 1e-12)     # matches F.normalize(eps=1e-12)
    emb_ref[...] = emb


# ----------------------------- pallas_call glue ----------------------------- #

@functools.partial(jax.jit, static_argnames=("c_out", "normalize"))
def sf2f_forward(x_ncl, w_all, shift_all, bias_all, *, c_out, normalize):
    """x_ncl: (B, C_in, L) float32 (PyTorch NCL). Returns (emb, seq_ncl)."""
    B, c_in, L = x_ncl.shape
    n_layers = w_all.shape[0]
    c_pad = w_all.shape[-1]
    total_stride = 2 ** n_layers
    if L % total_stride != 0:
        # TODO(synk): lengths not divisible by 2**n_layers need per-layer
        # right-pad handling; not required for this config.
        raise ValueError(f"sequence length must be a multiple of {total_stride}")
    n_out = L // total_stride

    # Batch blocking: TB elements per grid step.  Keep >= 2 grid steps so both
    # v7x TensorCores get work; cap TB so the per-step working set stays far
    # below the VMEM limit on every generation (incl. v7x's 64 MiB).
    tb = max(1, min(64, pl.cdiv(B, 2)))
    n_steps = pl.cdiv(B, tb)
    b_pad = tb * n_steps

    # NCL -> NLC, channels zero-padded to the lane-dense width c_pad, batch
    # zero-padded to a multiple of TB (padded elements are sliced off below).
    x_nlc = jnp.transpose(x_ncl, (0, 2, 1))
    x_pad = jnp.pad(x_nlc, ((0, b_pad - B), (0, 0), (0, c_pad - c_in)))

    kernel = functools.partial(_sf2f_fused_kernel, normalize=normalize)

    seq_full, emb_full = pl.pallas_call(
        kernel,
        out_shape=(
            jax.ShapeDtypeStruct((b_pad, n_out, c_pad), jnp.float32),
            jax.ShapeDtypeStruct((b_pad, 1, c_pad), jnp.float32),
        ),
        grid=(n_steps,),
        in_specs=[
            pl.BlockSpec((tb, L, c_pad), lambda b: (b, 0, 0)),
            # Constant block indices -> weights/params DMA'd once, VMEM-resident
            # for all grid steps.
            pl.BlockSpec(w_all.shape, lambda b: (0, 0, 0)),
            pl.BlockSpec(shift_all.shape, lambda b: (0, 0, 0)),
            pl.BlockSpec(bias_all.shape, lambda b: (0, 0, 0)),
        ],
        out_specs=(
            pl.BlockSpec((tb, n_out, c_pad), lambda b: (b, 0, 0)),
            pl.BlockSpec((tb, 1, c_pad), lambda b: (b, 0, 0)),
        ),
        compiler_params=pltpu.CompilerParams(
            dimension_semantics=("parallel",),      # batch across TCs on v7x
            vmem_limit_bytes=32 * 1024 * 1024,
        ),
    )(x_pad, w_all, shift_all, bias_all)

    # Strip the batch / lane zero padding only at the very end.
    seq = jnp.transpose(seq_full[:B, :, :c_out], (0, 2, 1))    # (B, c_out, L_f)
    emb = emb_full[:B, 0, :c_out].reshape(B, c_out, 1, 1)      # (B, c_out, 1, 1)
    return emb, seq


# ------------------------------- SF2FEncoder -------------------------------- #

class SF2FEncoderPallas:
    def __init__(self, model_config, key, matmul_dtype=jnp.bfloat16):
        self.input_channel = model_config['input_channel']
        self.channels = list(model_config['channels'])
        self.output_channel = model_config['output_channel']
        self.add_noise = model_config['add_noise']
        self.normalize_embedding = model_config['normalize']
        self.return_seq = model_config['return_seq']
        self.inception_mode = model_config['inception_mode']
        assert not self.inception_mode, "only the plain-conv path is implemented"
        # TODO(synk): Inception1DBlock source was not provided; inception path omitted.

        chans = [self.input_channel] + self.channels + [self.output_channel]
        self.n_layers = len(chans) - 1                     # 5 strided convs
        max_c = max(chans)
        self.c_pad = 128 * ((max_c + 127) // 128)          # lane-dense width

        eps = 1e-5
        keys = jax.random.split(key, 3 * (self.n_layers - 1) + 2)
        ki = 0

        # Packed weights: (n_layers, 3*c_pad, c_pad), K-blocks = [prev|center|next]
        # taps, with eval-mode BN scale folded into the output channels.
        w_all = jnp.zeros((self.n_layers, 3 * self.c_pad, self.c_pad), jnp.float32)
        shift_all = jnp.zeros((self.n_layers - 1, 1, self.c_pad), jnp.float32)

        self._raw = []     # per-layer (w, scale, shift) for the pure-JAX reference
        for li in range(self.n_layers - 1):
            c_in, c_out = chans[li], chans[li + 1]
            w = 0.1 * jax.random.normal(keys[ki], (c_out, c_in, 3), jnp.float32); ki += 1
            gamma = 1.0 + 0.1 * jax.random.normal(keys[ki], (c_out,), jnp.float32); ki += 1
            beta = 0.1 * jax.random.normal(keys[ki], (c_out,), jnp.float32); ki += 1
            rmean = 0.05 * jnp.sin(jnp.arange(c_out, dtype=jnp.float32))
            rvar = 0.8 + 0.4 * jax.nn.sigmoid(jnp.cos(jnp.arange(c_out, dtype=jnp.float32)))
            scale = gamma / jnp.sqrt(rvar + eps)           # eval-mode BN folding
            shift = beta - rmean * scale
            for k in range(3):
                wk = (w[:, :, k] * scale[:, None]).T       # (c_in, c_out), scale folded
                w_all = w_all.at[li, k * self.c_pad:k * self.c_pad + c_in, :c_out].set(wk)
            shift_all = shift_all.at[li, 0, :c_out].set(shift)
            self._raw.append((w, scale, shift))

        c_in, c_out = chans[-2], chans[-1]
        w_last = 0.1 * jax.random.normal(keys[ki], (c_out, c_in, 3), jnp.float32); ki += 1
        b_last = 0.05 * jax.random.normal(keys[ki], (c_out,), jnp.float32); ki += 1
        for k in range(3):
            w_all = w_all.at[self.n_layers - 1,
                             k * self.c_pad:k * self.c_pad + c_in,
                             :c_out].set(w_last[:, :, k].T)
        bias_all = jnp.zeros((1, 1, self.c_pad), jnp.float32).at[0, 0, :c_out].set(b_last)
        self._raw_last = (w_last, b_last)

        # Matmul operands stored in `matmul_dtype` (bf16 default: native MXU on
        # v6e/v7x and half the weight DMA; f32 accumulation in the kernel).
        self.w_all = w_all.astype(matmul_dtype)
        self.shift_all = shift_all
        self.bias_all = bias_all

    def forward(self, x_ncl):
        emb, seq = sf2f_forward(
            x_ncl, self.w_all, self.shift_all, self.bias_all,
            c_out=self.output_channel, normalize=self.normalize_embedding)
        # add_noise=False in this config.
        # TODO(synk): torch.randn noise path not implemented (not exercised).
        if self.return_seq:
            return emb, seq
        return emb

    # Pure-JAX reference (lax conv, f32) for correctness checking.
    def reference(self, x_ncl):
        def conv(x, w):
            return jax.lax.conv_general_dilated(
                x, w, window_strides=(2,), padding=[(1, 1)],
                dimension_numbers=('NCH', 'OIH', 'NCH'))

        x = x_ncl
        for (w, scale, shift) in self._raw:
            x = conv(x, w)
            x = jnp.maximum(x * scale[None, :, None] + shift[None, :, None], 0.0)
        w_last, b_last = self._raw_last
        x = conv(x, w_last) + b_last[None, :, None]
        emb = jnp.mean(x, axis=2)                                   # (B, C)
        if self.normalize_embedding:
            n = jnp.sqrt(jnp.sum(emb * emb, axis=-1, keepdims=True))
            emb = emb / jnp.maximum(n, 1e-12)
        return emb.reshape(x.shape[0], -1, 1, 1), x


if __name__ == "__main__":
    model_config = {
        'input_channel': 40,
        'channels': [16, 32, 32, 64],
        'output_channel': 64,
        'add_noise': False,
        'normalize': True,
        'return_seq': True,
        'inception_mode': False,
    }

    key = jax.random.PRNGKey(0)
    k_params, k_x = jax.random.split(key)
    enc = SF2FEncoderPallas(model_config, k_params)        # bf16 matmul weights

    B, C_in, L = 2, model_config['input_channel'], 64
    x = jax.random.normal(k_x, (B, C_in, L), jnp.float32)

    embeddings, seq = enc.forward(x)
    embeddings = jax.block_until_ready(embeddings)
    seq = jax.block_until_ready(seq)

    ref_emb, ref_seq = enc.reference(x)
    assert embeddings.shape == (B, model_config['output_channel'], 1, 1)
    assert seq.shape == ref_seq.shape
    # bf16 MXU operands (f32 accumulation) vs f32 reference: loosen tolerance.
    tol = 5e-2 if enc.w_all.dtype == jnp.bfloat16 else 1e-4
    assert jnp.allclose(embeddings, ref_emb, rtol=tol, atol=tol)
    assert jnp.allclose(seq, ref_seq, rtol=tol, atol=tol)

    print("KERNEL_OK")
</pallas_src>

<mosaic_0001>
module attributes {stable_mosaic.version = 11 : i64} {
  func.func @_sf2f_fused_kernel(%arg0: i32, %arg1: memref<1x64x128xf32, #tpu.memory_space<vmem>>, %arg2: memref<5x384x128xbf16, #tpu.memory_space<vmem>>, %arg3: memref<4x1x128xf32, #tpu.memory_space<vmem>>, %arg4: memref<1x1x128xf32, #tpu.memory_space<vmem>>, %arg5: memref<1x2x128xf32, #tpu.memory_space<vmem>>, %arg6: memref<1x1x128xf32, #tpu.memory_space<vmem>>) attributes {dimension_semantics = [#tpu.dimension_semantics<parallel>], iteration_bounds = array<i64: 2>, scalar_prefetch = 0 : i64, scratch_operands = 0 : i64, tpu.core_type = #tpu.core_type<tc>, window_params = [{transform_indices = @transform_0, window_bounds = array<i64: 1, 64, 128>}, {pipeline_mode = #tpu.pipeline_mode<synchronous>, transform_indices = @transform_1, window_bounds = array<i64: 5, 384, 128>}, {pipeline_mode = #tpu.pipeline_mode<synchronous>, transform_indices = @transform_2, window_bounds = array<i64: 4, 1, 128>}, {pipeline_mode = #tpu.pipeline_mode<synchronous>, transform_indices = @transform_3, window_bounds = array<i64: 1, 1, 128>}, {transform_indices = @transform_4, window_bounds = array<i64: 1, 2, 128>}, {transform_indices = @transform_5, window_bounds = array<i64: 1, 1, 128>}]} {
    %0 = tpu.iota {dimensions = array<i32: 1>} : vector<1x64x128xi32>
    %1 = vector.shape_cast %0 : vector<1x64x128xi32> to vector<64x128xi32>
    %c0 = arith.constant 0 : index
    %c0_0 = arith.constant 0 : index
    %c0_1 = arith.constant 0 : index
    %2 = vector.load %arg1[%c0, %c0_0, %c0_1] : memref<1x64x128xf32, #tpu.memory_space<vmem>>, vector<1x64x128xf32>
    %3 = vector.shape_cast %2 : vector<1x64x128xf32> to vector<64x128xf32>
    %c1_i32 = arith.constant 1 : i32
    %4 = vector.broadcast %c1_i32 : i32 to vector<64x128xi32>
    %5 = arith.cmpi sge, %1, %4 : vector<64x128xi32>
    %c1_i32_2 = arith.constant 1 : i32
    %6 = tpu.dynamic_rotate %3 by %c1_i32_2 dim 0 : vector<64x128xf32>, i32 -> vector<64x128xf32>
    %cst = arith.constant 0.000000e+00 : f32
    %7 = vector.broadcast %cst : f32 to vector<64x128xf32>
    %8 = arith.select %5, %6, %7 : vector<64x128xi1>, vector<64x128xf32>
    %c63_i32 = arith.constant 63 : i32
    %9 = vector.broadcast %c63_i32 : i32 to vector<64x128xi32>
    %10 = arith.cmpi slt, %1, %9 : vector<64x128xi32>
    %c63_i32_3 = arith.constant 63 : i32
    %11 = tpu.dynamic_rotate %3 by %c63_i32_3 dim 0 : vector<64x128xf32>, i32 -> vector<64x128xf32>
    %cst_4 = arith.constant 0.000000e+00 : f32
    %12 = vector.broadcast %cst_4 : f32 to vector<64x128xf32>
    %13 = arith.select %10, %11, %12 : vector<64x128xi1>, vector<64x128xf32>
    %14 = tpu.concatenate %8, %3, %13 in 1 : vector<64x128xf32>, vector<64x128xf32>, vector<64x128xf32> -> vector<64x384xf32>
    %15 = arith.truncf %14 : vector<64x384xf32> to vector<64x384xbf16>
    %c0_5 = arith.constant 0 : index
    %c0_6 = arith.constant 0 : index
    %c0_7 = arith.constant 0 : index
    %16 = vector.load %arg2[%c0_5, %c0_6, %c0_7] : memref<5x384x128xbf16, #tpu.memory_space<vmem>>, vector<1x384x128xbf16>
    %17 = vector.shape_cast %16 : vector<1x384x128xbf16> to vector<384x128xbf16>
    %cst_8 = arith.constant dense<0.000000e+00> : vector<64x128xf32>
    %18 = tpu.matmul %15, %17, %cst_8 {dimension_numbers = #tpu.dot_dimension_numbers<[1], [0], [0], [1], [0, 0, 1, 1], [], []>} : vector<64x384xbf16>, vector<384x128xbf16>, vector<64x128xf32> -> vector<64x128xf32>
    %c0_9 = arith.constant 0 : index
    %c0_10 = arith.constant 0 : index
    %c0_11 = arith.constant 0 : index
    %19 = vector.load %arg3[%c0_9, %c0_10, %c0_11] : memref<4x1x128xf32, #tpu.memory_space<vmem>>, vector<1x1x128xf32>
    %20 = vector.shape_cast %19 : vector<1x1x128xf32> to vector<1x128xf32>
    %21 = vector.broadcast %20 : vector<1x128xf32> to vector<64x128xf32>
    %22 = arith.addf %18, %21 : vector<64x128xf32>
    %cst_12 = arith.constant 0.000000e+00 : f32
    %23 = vector.broadcast %cst_12 : f32 to vector<64x128xf32>
    %24 = arith.maximumf %22, %23 : vector<64x128xf32>
    %c2_i32 = arith.constant 2 : i32
    %25 = vector.broadcast %c2_i32 : i32 to vector<64x128xi32>
    %26 = arith.cmpi sge, %1, %25 : vector<64x128xi32>
    %c2_i32_13 = arith.constant 2 : i32
    %27 = tpu.dynamic_rotate %24 by %c2_i32_13 dim 0 : vector<64x128xf32>, i32 -> vector<64x128xf32>
    %cst_14 = arith.constant 0.000000e+00 : f32
    %28 = vector.broadcast %cst_14 : f32 to vector<64x128xf32>
    %29 = arith.select %26, %27, %28 : vector<64x128xi1>, vector<64x128xf32>
    %c62_i32 = arith.constant 62 : i32
    %30 = vector.broadcast %c62_i32 : i32 to vector<64x128xi32>
    %31 = arith.cmpi slt, %1, %30 : vector<64x128xi32>
    %c62_i32_15 = arith.constant 62 : i32
    %32 = tpu.dynamic_rotate %24 by %c62_i32_15 dim 0 : vector<64x128xf32>, i32 -> vector<64x128xf32>
    %cst_16 = arith.constant 0.000000e+00 : f32
    %33 = vector.broadcast %cst_16 : f32 to vector<64x128xf32>
    %34 = arith.select %31, %32, %33 : vector<64x128xi1>, vector<64x128xf32>
    %35 = tpu.concatenate %29, %24, %34 in 1 : vector<64x128xf32>, vector<64x128xf32>, vector<64x128xf32> -> vector<64x384xf32>
    %36 = arith.truncf %35 : vector<64x384xf32> to vector<64x384xbf16>
    %c1 = arith.constant 1 : index
    %c0_17 = arith.constant 0 : index
    %c0_18 = arith.constant 0 : index
    %37 = vector.load %arg2[%c1, %c0_17, %c0_18] : memref<5x384x128xbf16, #tpu.memory_space<vmem>>, vector<1x384x128xbf16>
    %38 = vector.shape_cast %37 : vector<1x384x128xbf16> to vector<384x128xbf16>
    %cst_19 = arith.constant dense<0.000000e+00> : vector<64x128xf32>
    %39 = tpu.matmul %36, %38, %cst_19 {dimension_numbers = #tpu.dot_dimension_numbers<[1], [0], [0], [1], [0, 0, 1, 1], [], []>} : vector<64x384xbf16>, vector<384x128xbf16>, vector<64x128xf32> -> vector<64x128xf32>
    %c1_20 = arith.constant 1 : index
    %c0_21 = arith.constant 0 : index
    %c0_22 = arith.constant 0 : index
    %40 = vector.load %arg3[%c1_20, %c0_21, %c0_22] : memref<4x1x128xf32, #tpu.memory_space<vmem>>, vector<1x1x128xf32>
    %41 = vector.shape_cast %40 : vector<1x1x128xf32> to vector<1x128xf32>
    %42 = vector.broadcast %41 : vector<1x128xf32> to vector<64x128xf32>
    %43 = arith.addf %39, %42 : vector<64x128xf32>
    %cst_23 = arith.constant 0.000000e+00 : f32
    %44 = vector.broadcast %cst_23 : f32 to vector<64x128xf32>
    %45 = arith.maximumf %43, %44 : vector<64x128xf32>
    %c4_i32 = arith.constant 4 : i32
    %46 = vector.broadcast %c4_i32 : i32 to vector<64x128xi32>
    %47 = arith.cmpi sge, %1, %46 : vector<64x128xi32>
    %c4_i32_24 = arith.constant 4 : i32
    %48 = tpu.dynamic_rotate %45 by %c4_i32_24 dim 0 : vector<64x128xf32>, i32 -> vector<64x128xf32>
    %cst_25 = arith.constant 0.000000e+00 : f32
    %49 = vector.broadcast %cst_25 : f32 to vector<64x128xf32>
    %50 = arith.select %47, %48, %49 : vector<64x128xi1>, vector<64x128xf32>
    %c60_i32 = arith.constant 60 : i32
    %51 = vector.broadcast %c60_i32 : i32 to vector<64x128xi32>
    %52 = arith.cmpi slt, %1, %51 : vector<64x128xi32>
    %c60_i32_26 = arith.constant 60 : i32
    %53 = tpu.dynamic_rotate %45 by %c60_i32_26 dim 0 : vector<64x128xf32>, i32 -> vector<64x128xf32>
    %cst_27 = arith.constant 0.000000e+00 : f32
    %54 = vector.broadcast %cst_27 : f32 to vector<64x128xf32>
    %55 = arith.select %52, %53, %54 : vector<64x128xi1>, vector<64x128xf32>
    %56 = tpu.concatenate %50, %45, %55 in 1 : vector<64x128xf32>, vector<64x128xf32>, vector<64x128xf32> -> vector<64x384xf32>
    %57 = arith.truncf %56 : vector<64x384xf32> to vector<64x384xbf16>
    %c2 = arith.constant 2 : index
    %c0_28 = arith.constant 0 : index
    %c0_29 = arith.constant 0 : index
    %58 = vector.load %arg2[%c2, %c0_28, %c0_29] : memref<5x384x128xbf16, #tpu.memory_space<vmem>>, vector<1x384x128xbf16>
    %59 = vector.shape_cast %58 : vector<1x384x128xbf16> to vector<384x128xbf16>
    %cst_30 = arith.constant dense<0.000000e+00> : vector<64x128xf32>
    %60 = tpu.matmul %57, %59, %cst_30 {dimension_numbers = #tpu.dot_dimension_numbers<[1], [0], [0], [1], [0, 0, 1, 1], [], []>} : vector<64x384xbf16>, vector<384x128xbf16>, vector<64x128xf32> -> vector<64x128xf32>
    %c2_31 = arith.constant 2 : index
    %c0_32 = arith.constant 0 : index
    %c0_33 = arith.constant 0 : index
    %61 = vector.load %arg3[%c2_31, %c0_32, %c0_33] : memref<4x1x128xf32, #tpu.memory_space<vmem>>, vector<1x1x128xf32>
    %62 = vector.shape_cast %61 : vector<1x1x128xf32> to vector<1x128xf32>
    %63 = vector.broadcast %62 : vector<1x128xf32> to vector<64x128xf32>
    %64 = arith.addf %60, %63 : vector<64x128xf32>
    %cst_34 = arith.constant 0.000000e+00 : f32
    %65 = vector.broadcast %cst_34 : f32 to vector<64x128xf32>
    %66 = arith.maximumf %64, %65 : vector<64x128xf32>
    %c8_i32 = arith.constant 8 : i32
    %67 = vector.broadcast %c8_i32 : i32 to vector<64x128xi32>
    %68 = arith.cmpi sge, %1, %67 : vector<64x128xi32>
    %c8_i32_35 = arith.constant 8 : i32
    %69 = tpu.dynamic_rotate %66 by %c8_i32_35 dim 0 : vector<64x128xf32>, i32 -> vector<64x128xf32>
    %cst_36 = arith.constant 0.000000e+00 : f32
    %70 = vector.broadcast %cst_36 : f32 to vector<64x128xf32>
    %71 = arith.select %68, %69, %70 : vector<64x128xi1>, vector<64x128xf32>
    %c56_i32 = arith.constant 56 : i32
    %72 = vector.broadcast %c56_i32 : i32 to vector<64x128xi32>
    %73 = arith.cmpi slt, %1, %72 : vector<64x128xi32>
    %c56_i32_37 = arith.constant 56 : i32
    %74 = tpu.dynamic_rotate %66 by %c56_i32_37 dim 0 : vector<64x128xf32>, i32 -> vector<64x128xf32>
    %cst_38 = arith.constant 0.000000e+00 : f32
    %75 = vector.broadcast %cst_38 : f32 to vector<64x128xf32>
    %76 = arith.select %73, %74, %75 : vector<64x128xi1>, vector<64x128xf32>
    %77 = tpu.concatenate %71, %66, %76 in 1 : vector<64x128xf32>, vector<64x128xf32>, vector<64x128xf32> -> vector<64x384xf32>
    %78 = arith.truncf %77 : vector<64x384xf32> to vector<64x384xbf16>
    %c3 = arith.constant 3 : index
    %c0_39 = arith.constant 0 : index
    %c0_40 = arith.constant 0 : index
    %79 = vector.load %arg2[%c3, %c0_39, %c0_40] : memref<5x384x128xbf16, #tpu.memory_space<vmem>>, vector<1x384x128xbf16>
    %80 = vector.shape_cast %79 : vector<1x384x128xbf16> to vector<384x128xbf16>
    %cst_41 = arith.constant dense<0.000000e+00> : vector<64x128xf32>
    %81 = tpu.matmul %78, %80, %cst_41 {dimension_numbers = #tpu.dot_dimension_numbers<[1], [0], [0], [1], [0, 0, 1, 1], [], []>} : vector<64x384xbf16>, vector<384x128xbf16>, vector<64x128xf32> -> vector<64x128xf32>
    %c3_42 = arith.constant 3 : index
    %c0_43 = arith.constant 0 : index
    %c0_44 = arith.constant 0 : index
    %82 = vector.load %arg3[%c3_42, %c0_43, %c0_44] : memref<4x1x128xf32, #tpu.memory_space<vmem>>, vector<1x1x128xf32>
    %83 = vector.shape_cast %82 : vector<1x1x128xf32> to vector<1x128xf32>
    %84 = vector.broadcast %83 : vector<1x128xf32> to vector<64x128xf32>
    %85 = arith.addf %81, %84 : vector<64x128xf32>
    %cst_45 = arith.constant 0.000000e+00 : f32
    %86 = vector.broadcast %cst_45 : f32 to vector<64x128xf32>
    %87 = arith.maximumf %85, %86 : vector<64x128xf32>
    %c16_i32 = arith.constant 16 : i32
    %88 = vector.broadcast %c16_i32 : i32 to vector<64x128xi32>
    %89 = arith.cmpi sge, %1, %88 : vector<64x128xi32>
    %c16_i32_46 = arith.constant 16 : i32
    %90 = tpu.dynamic_rotate %87 by %c16_i32_46 dim 0 : vector<64x128xf32>, i32 -> vector<64x128xf32>
    %cst_47 = arith.constant 0.000000e+00 : f32
    %91 = vector.broadcast %cst_47 : f32 to vector<64x128xf32>
    %92 = arith.select %89, %90, %91 : vector<64x128xi1>, vector<64x128xf32>
    %c48_i32 = arith.constant 48 : i32
    %93 = vector.broadcast %c48_i32 : i32 to vector<64x128xi32>
    %94 = arith.cmpi slt, %1, %93 : vector<64x128xi32>
    %c48_i32_48 = arith.constant 48 : i32
    %95 = tpu.dynamic_rotate %87 by %c48_i32_48 dim 0 : vector<64x128xf32>, i32 -> vector<64x128xf32>
    %cst_49 = arith.constant 0.000000e+00 : f32
    %96 = vector.broadcast %cst_49 : f32 to vector<64x128xf32>
    %97 = arith.select %94, %95, %96 : vector<64x128xi1>, vector<64x128xf32>
    %98 = tpu.concatenate %92, %87, %97 in 1 : vector<64x128xf32>, vector<64x128xf32>, vector<64x128xf32> -> vector<64x384xf32>
    %99 = arith.truncf %98 : vector<64x384xf32> to vector<64x384xbf16>
    %c4 = arith.constant 4 : index
    %c0_50 = arith.constant 0 : index
    %c0_51 = arith.constant 0 : index
    %100 = vector.load %arg2[%c4, %c0_50, %c0_51] : memref<5x384x128xbf16, #tpu.memory_space<vmem>>, vector<1x384x128xbf16>
    %101 = vector.shape_cast %100 : vector<1x384x128xbf16> to vector<384x128xbf16>
    %cst_52 = arith.constant dense<0.000000e+00> : vector<64x128xf32>
    %102 = tpu.matmul %99, %101, %cst_52 {dimension_numbers = #tpu.dot_dimension_numbers<[1], [0], [0], [1], [0, 0, 1, 1], [], []>} : vector<64x384xbf16>, vector<384x128xbf16>, vector<64x128xf32> -> vector<64x128xf32>
    %c0_53 = arith.constant 0 : index
    %c0_54 = arith.constant 0 : index
    %c0_55 = arith.constant 0 : index
    %103 = vector.load %arg4[%c0_53, %c0_54, %c0_55] : memref<1x1x128xf32, #tpu.memory_space<vmem>>, vector<1x1x128xf32>
    %104 = vector.shape_cast %103 : vector<1x1x128xf32> to vector<1x128xf32>
    %105 = vector.broadcast %104 : vector<1x128xf32> to vector<64x128xf32>
    %106 = arith.addf %102, %105 : vector<64x128xf32>
    %107 = vector.shape_cast %106 : vector<64x128xf32> to vector<2x32x128xf32>
    %108 = vector.extract_strided_slice %107 {offsets = [0, 0, 0], sizes = [2, 1, 128], strides = [1, 1, 1]} : vector<2x32x128xf32> to vector<2x1x128xf32>
    %109 = vector.shape_cast %108 : vector<2x1x128xf32> to vector<2x128xf32>
    %110 = vector.shape_cast %109 : vector<2x128xf32> to vector<1x2x128xf32>
    %c0_56 = arith.constant 0 : index
    %c0_57 = arith.constant 0 : index
    %c0_58 = arith.constant 0 : index
    %111 = vector.load %arg5[%c0_56, %c0_57, %c0_58] : memref<1x2x128xf32, #tpu.memory_space<vmem>>, vector<1x2x128xf32>
    tpu.vector_store %arg5[%c0_56, %c0_57, %c0_58], %110 {strides = array<i32>} : memref<1x2x128xf32, #tpu.memory_space<vmem>>, vector<1x2x128xf32>,
    %cst_59 = arith.constant dense<0.000000e+00> : vector<1x128xf32>
    %112 = vector.multi_reduction <add>, %110, %cst_59 [1] : vector<1x2x128xf32> to vector<1x128xf32>
    %113 = vector.shape_cast %112 : vector<1x128xf32> to vector<1x1x128xf32>
    %cst_60 = arith.constant 5.000000e-01 : f32
    %114 = vector.broadcast %cst_60 : f32 to vector<1x1x128xf32>
    %115 = arith.mulf %113, %114 : vector<1x1x128xf32>
    %116 = arith.mulf %115, %115 : vector<1x1x128xf32>
    %cst_61 = arith.constant dense<0.000000e+00> : vector<1x1xf32>
    %117 = vector.multi_reduction <add>, %116, %cst_61 [2] : vector<1x1x128xf32> to vector<1x1xf32>
    %118 = vector.shape_cast %117 : vector<1x1xf32> to vector<1x1x1xf32>
    %119 = math.sqrt %118 : vector<1x1x1xf32>
    %cst_62 = arith.constant 9.99999996E-13 : f32
    %120 = vector.broadcast %cst_62 : f32 to vector<1x1x1xf32>
    %121 = arith.maximumf %119, %120 : vector<1x1x1xf32>
    %122 = vector.broadcast %121 : vector<1x1x1xf32> to vector<1x1x128xf32>
    %123 = arith.divf %115, %122 : vector<1x1x128xf32>
    %c0_63 = arith.constant 0 : index
    %c0_64 = arith.constant 0 : index
    %c0_65 = arith.constant 0 : index
    %124 = vector.load %arg6[%c0_63, %c0_64, %c0_65] : memref<1x1x128xf32, #tpu.memory_space<vmem>>, vector<1x1x128xf32>
    tpu.vector_store %arg6[%c0_63, %c0_64, %c0_65], %123 {strides = array<i32>} : memref<1x1x128xf32, #tpu.memory_space<vmem>>, vector<1x1x128xf32>,
    return
  }
  func.func @transform_0(%arg0: i32) -> (i32, i32, i32) {
    %c0_i32 = arith.constant 0 : i32
    %c0_i32_0 = arith.constant 0 : i32
    %c0_i32_1 = arith.constant 0 : i32
    return %arg0, %c0_i32, %c0_i32_0 : i32, i32, i32
  }
  func.func @transform_1(%arg0: i32) -> (i32, i32, i32) {
    %c0_i32 = arith.constant 0 : i32
    %c0_i32_0 = arith.constant 0 : i32
    %c0_i32_1 = arith.constant 0 : i32
    %c0_i32_2 = arith.constant 0 : i32
    return %c0_i32, %c0_i32_0, %c0_i32_1 : i32, i32, i32
  }
  func.func @transform_2(%arg0: i32) -> (i32, i32, i32) {
    %c0_i32 = arith.constant 0 : i32
    %c0_i32_0 = arith.constant 0 : i32
    %c0_i32_1 = arith.constant 0 : i32
    %c0_i32_2 = arith.constant 0 : i32
    return %c0_i32, %c0_i32_0, %c0_i32_1 : i32, i32, i32
  }
  func.func @transform_3(%arg0: i32) -> (i32, i32, i32) {
    %c0_i32 = arith.constant 0 : i32
    %c0_i32_0 = arith.constant 0 : i32
    %c0_i32_1 = arith.constant 0 : i32
    %c0_i32_2 = arith.constant 0 : i32
    return %c0_i32, %c0_i32_0, %c0_i32_1 : i32, i32, i32
  }
  func.func @transform_4(%arg0: i32) -> (i32, i32, i32) {
    %c0_i32 = arith.constant 0 : i32
    %c0_i32_0 = arith.constant 0 : i32
    %c0_i32_1 = arith.constant 0 : i32
    return %arg0, %c0_i32, %c0_i32_0 : i32, i32, i32
  }
  func.func @transform_5(%arg0: i32) -> (i32, i32, i32) {
    %c0_i32 = arith.constant 0 : i32
    %c0_i32_0 = arith.constant 0 : i32
    %c0_i32_1 = arith.constant 0 : i32
    return %arg0, %c0_i32, %c0_i32_0 : i32, i32, i32
  }
}

</mosaic_0001>

<bundles_post_ra>
// kernel: sf2f_forward.1
= control target key start
LH: loop header
LB: loop body
LE: loop exit
PB: predicated region body
PF: predicated region fallthrough
CT: control target
= control target key end

     0   :  { %11 = vsyncpa [#allocation3], 0  ;;  %s3127_s18 = smov 0   ;;  %s3419_s0 = inlined_call_operand.vmem [shape: f32[2,64,128], index: 0, kind: input, shape index: {}]   ;;  %s3420_s1 = inlined_call_operand.hbm [shape: bf16[5,384,128], index: 1, kind: input, shape index: {}]   ;;  %s3421_s2 = inlined_call_operand.vmem [shape: f32[4,1,128], index: 2, kind: input, shape index: {}]   ;;  %s3422_s3 = inlined_call_operand.vmem [shape: f32[1,1,128], index: 3, kind: input, shape index: {}]   ;;  %s3423_s4 = inlined_call_operand.vmem [shape: f32[2,2,128], index: 4, kind: output, shape index: {0}]   ;;  %s3424_s5 = inlined_call_operand.vmem [shape: f32[2,1,128], index: 5, kind: output, shape index: {1}]  }
   0x1 LB: > { %s3133_s19 = sadd.s32 4294967295, %s3089_s18   ;;  %p2366_p0 = scmp.ge.s32.totalorder %s3089_s18, 1  ;;  %s3089_s18 = sphi %s3127_s18, %s17_s18  }
   0x2   : > { %p163_p1 = scmp.lt.s32.totalorder %s3089_s18, 3  ;;  %s3091_s20 = smov [#allocation2]  }
   0x3   : > { %s175_s21 = sshll.u32 %s3091_s20, 4  ;;  %p3425_p3 = scmp.eq.s32.totalorder %s3133_s19, 0  ;;  %s176_s21 = int_to_ptr.vmem [resolvable:$true] %s175_s21 }
   0x4   : > { %p3137_p2 = pnand %p2366_p0, %p163_p1  ;;  %s3051_s26 = scalar_lea.hbm %s3420_s1, 15360 }
   0x5   : > { %p3052_p6 = scmp.ne.s32.totalorder %s3420_s1, %s3051_s26  ;;  %p3058_p10 = scmp.lt.u32.totalorder %s3051_s26, %s3420_s1 }
   0x6   : > { %s3427_s22 = scalar_select %p3137_p2, 1, 0 }
   0x7   : > { %p2907_p4 = pneg %p3137_p2 }
   0x9   : > { %p3146_p5 = pnand %p3425_p3, %p2907_p4 }
   0xb   : > { %p3053_p7 = pneg %p3146_p5 }
   0xd   : > { %p3054_p8 = pnand %p3053_p7, %p3052_p6 }
   0xf   : > { %p3055_p9 = pneg %p3054_p8 }
  0x11   : > { %p3060_p11 = pnand %p3058_p10, %p3055_p9 }
  0x13   : > { %3063 = shalt.err (!%p3060_p11)
}
  0x14   : > { %s3064_s6 = scalar_lea.vmem %s176_s21, 15360  ;;  %p3072_p1 = scmp.lt.s32.totalorder %s176_s21, %s176_s21 }
  0x15   : > { %p3065_p12 = scmp.ne.s32.totalorder %s176_s21, %s3064_s6  ;;  %p3073_p4 = scmp.lt.s32.totalorder %s3064_s6, %s3064_s6 }
  0x17   : > { %p3067_p13 = pnand %p3065_p12, %p3053_p7  ;;  %p3074_p3 = por %p3073_p4, %p3072_p1 }
  0x19   : > { %p3068_p0 = pneg %p3067_p13 }
  0x1b   : > { %p3075_p2 = pnand %p3074_p3, %p3068_p0 }
  0x1d   : > { %3078 = shalt.err (!%p3075_p2)
}
  0x1e   : > { %s3092_s7 = smov 64   ;;  %s3093_s8 = smov 4  }
  0x1f   : > { %2910 = dma.hbm_to_vmem [thread:$0]  (!%p3146_p5), %s3420_s1, 15360, %s176_s21, [#allocation3], %s3092_s7, %s3092_s7, %s3093_s8  }
  0x20   : > { %p3429_p6 = scmp.ne.s32.totalorder %s3427_s22, 0 }
  0x21   : > { %p3430_p8 = scmp.eq.s32.totalorder (!%p3429_p6), %s3133_s19, 0 }
  0x22   : > { %205 = sbr.rel (%p3429_p6) target bundleno = 1470 (0x5be), region = 36 }
  0x29   : > { %3084 = dma.done.wait (%p3430_p8), [#allocation3], 15360   ;;  %p3431_p7 = pmov %p3430_p8 }
  0x2a   : > { %v2927_v0 = vld [vmem:[#allocation2 + $0x40] sm:$0xff]   ;;  %v2929_v2 = vld [vmem:[#allocation2 + $0x48] sm:$0xff]   ;;  %v2932_v5 = vld [vmem:[#allocation2 + $0x50] sm:$0xff]   ;;  %p235_p2 = scmp.lt.s32.totalorder %s3133_s19, 1  ;;  %v248_v15 = vlaneseq  ;;  %vm3094_vm4 = vmmov 1  }
  0x2b   : > { %3086 = vsyncadd (%p3431_p7), [#allocation3], 4294951936  ;;  %v2928_v1 = vld [vmem:[#allocation2] sm:$0xff]   ;;  %2523 = vmatprep.subr.bf16.mxu0 %v2927_v0  ;;  %v2931_v4 = vld [vmem:[#allocation2 + $0x8] sm:$0xff]  }
  0x2c   : > { %2524 = vmatpush3.bf16.msra.mxu0 %v2928_v1  ;;  %v2930_v3 = vld [vmem:[#allocation2 + $0x80] sm:$0xff]   ;;  %v2933_v6 = vld [vmem:[#allocation2 + $0x88] sm:$0xff]   ;;  %v2934_v7 = vld [vmem:[#allocation2 + $0x10] sm:$0xff]   ;;  %s3435_s19 = smov (!%p235_p2, %s3133_s19), 1  ;;  %v3177_v19 = vshrl.u32 %v248_v15, 7 }
  0x2d   : > { %2525 = vmatprep.subr.bf16.mxu0 %v2929_v2  ;;  %2783 = vmatprep.subr.bf16.mxu1 %v2930_v3  ;;  %v2935_v8 = vld [vmem:[#allocation2 + $0x58] sm:$0xff]   ;;  %v2936_v9 = vld [vmem:[#allocation2 + $0x90] sm:$0xff]   ;;  %v2938_v11 = vld [vmem:[#allocation2 + $0x60] sm:$0xff]   ;;  %s2522_s11 = sshll.u32 %s3435_s19, 6  ;;  %s2373_s27 = sshll.u32 %s3435_s19, 1 }
  0x2e   : > { %2784 = vmatpush3.bf16.msra.mxu1 %v2930_v3  ;;  %v2937_v10 = vld [vmem:[#allocation2 + $0x18] sm:$0xff]   ;;  %v2940_v13 = vld [vmem:[#allocation2 + $0x20] sm:$0xff]   ;;  %v2941_v16 = vld [vmem:[#allocation2 + $0x68] sm:$0xff]   ;;  %s3182_s14 = scalar_lea.vmem %s3419_s0, %s2522_s11  ;;  %v3185_v24 = vadd.s32 56, %v3177_v19  ;;  %vm281_vm0 = vcmp.lt.s32.totalorder %v3177_v19, 1  ;;  %vm314_vm1 = vcmp.lt.s32.totalorder %v3177_v19, 7  ;;  %s243_s30 = scalar_lea.vmem %s3423_s4, %s2373_s27 }
  0x2f   : > { %2785 = vmatprep.subr.bf16.mxu1 %v2933_v6  ;;  %v2939_v12 = vld [vmem:[#allocation2 + $0x98] sm:$0xff]   ;;  %v2942_v14 = vld [vmem:[#allocation2 + $0xa0] sm:$0xff]   ;;  %v2943_v17 = vld [vmem:[#allocation2 + $0x28] sm:$0xff]   ;;  %vm265_vm2 = vcmp.ge.s32.totalorder %v3177_v19, 1  ;;  %vm696_vm7 = vcmp.lt.s32.totalorder %v3177_v19, 2  ;;  %vm729_vm8 = vcmp.lt.s32.totalorder %v3177_v19, 6  ;;  %s246_s8 = scalar_lea.vmem %s3424_s5, %s3435_s19 }
  0x30   : > { %2526 = vmatpush3.bf16.msra.mxu0 %v2931_v4  ;;  %v2945_v18 = vld [vmem:[#allocation2 + $0xa8] sm:$0xff]   ;;  %v2944_v20 = vld [vmem:[#allocation2 + $0x70] sm:$0xff]   ;;  %v2947_v22 = vld [vmem:[#allocation2 + $0x78] sm:$0xff]   ;;  %vm305_vm3 = vcmp.lt.s32.totalorder %v3185_v24, 63  ;;  %vm680_vm9 = vcmp.ge.s32.totalorder %v3177_v19, 2  ;;  %vm720_vm10 = vcmp.lt.s32.totalorder %v3185_v24, 62 }
  0x31   : > { %2527 = vmatprep.subr.bf16.mxu0 %v2932_v5  ;;  %v2946_v21 = vld [vmem:[#allocation2 + $0x30] sm:$0xff]   ;;  %v3188_v25 = vld [vmem:[%s3182_s14] sm:$0xff]  ;;  %v3191_v26 = vld [vmem:[%s3182_s14 + $0x8] sm:$0xff]  ;;  %vm1113_vm13 = vcmp.lt.s32.totalorder %v3177_v19, 4  ;;  %vm1097_vm14 = vcmp.ge.s32.totalorder %v3177_v19, 4  ;;  %vm1137_vm15 = vcmp.lt.s32.totalorder %v3185_v24, 60 }
  0x32   : > { %2786 = vmatpush3.bf16.msra.mxu1 %v2933_v6  ;;  %v2948_v23 = vld [vmem:[#allocation2 + $0xb0] sm:$0xff]   ;;  %v3194_v27 = vld [vmem:[%s3182_s14 + $0x38] sm:$0xff]  ;;  %v273_v28 = vrot.slane %v3188_v25, 7  ;;  %v274_v29 = vrot.slane %v3191_v26, 7  ;;  %v306_v30 = vrot.slane %v3188_v25, 1  ;;  %v307_v31 = vrot.slane %v3191_v26, 1  ;;  %vm2399_vm5 = vmpackc.low %vm3094_vm4, %vm265_vm2 }
  0x33   : > { %2787 = vmatprep.subr.bf16.mxu1 %v2936_v9  ;;  %v332_v32 = vpack.c.bf16 %v3191_v26, %v3188_v25  ;;  %v280_v33 = vrot.slane %v3194_v27, 7  ;;  %v259_v34 = vld [vmem:[%s3182_s14 + $0x10] sm:$0xff]  ;;  %v2949_v35 = vld [vmem:[#allocation2 + $0x38] sm:$0xff]   ;;  %v261_v40 = vld [vmem:[%s3182_s14 + $0x20] sm:$0xff]  ;;  %v313_v48 = vrot.slane %v3194_v27, 1  ;;  %vm2245_vm2 = vcmask 1041409  }
  0x34   : > { %2528 = vmatpush3.bf16.msra.mxu0 %v2934_v7  ;;  %v288_v36 = vsel %vm281_vm0, %v273_v28, %v274_v29  ;;  %v308_v37 = vrot.slane %v259_v34, 1  ;;  %v321_v38 = vsel %vm314_vm1, %v306_v30, %v307_v31  ;;  %v260_v39 = vld [vmem:[%s3182_s14 + $0x18] sm:$0xff]  ;;  %v310_v44 = vrot.slane %v261_v40, 1  ;;  %v262_v45 = vld [vmem:[%s3182_s14 + $0x28] sm:$0xff]  ;;  %v263_v47 = vld [vmem:[%s3182_s14 + $0x30] sm:$0xff] }
  0x35   : > { %2529 = vmatprep.subr.bf16.mxu0 %v2935_v8  ;;  %v289_v41 = vsel %vm281_vm0, %v280_v33, %v273_v28  ;;  %v2950_v42 = vld [vmem:[#allocation2 + $0xb8] sm:$0xff]   ;;  %v309_v43 = vrot.slane %v260_v39, 1  ;;  %574 = vmatprep.mubr.bf16.mxu0 %v332_v32  ;;  %v275_v51 = vrot.slane %v259_v34, 7  ;;  %v2951_v52 = vld [vmem:[#allocation2 + $0x140] sm:$0xff]   ;;  %v276_v55 = vrot.slane %v260_v39, 7  ;;  %vm3237_vm6 = vmpackc.low %vm305_vm3, %vm3094_vm4 }
  0x36   : > { %2788 = vmatpush3.bf16.msra.mxu1 %v2936_v9  ;;  %v320_v46 = vsel %vm314_vm1, %v307_v31, %v308_v37  ;;  %v2400_v49 = vpack.c.bf16 %v288_v36, %v289_v41  ;;  %v311_v56 = vrot.slane %v262_v45, 1  ;;  %v335_v57 = vpack.c.bf16 %v260_v39, %v259_v34  ;;  %v2958_v25 = vld [vmem:[#allocation2 + $0xc8] sm:$0xff]   ;;  %v2959_v26 = vld [vmem:[#allocation2 + $0x160] sm:$0xff]   ;;  %v2961_v28 = vld [vmem:[#allocation2 + $0xd0] sm:$0xff]  }
  0x37   : > { %2789 = vmatprep.subr.bf16.mxu1 %v2939_v12  ;;  %v333_v50 = vpack.c.bf16 %v320_v46, %v321_v38  ;;  %v318_v53 = vsel %vm314_vm1, %v309_v43, %v310_v44  ;;  %v319_v54 = vsel %vm314_vm1, %v308_v37, %v309_v43  ;;  %v278_v58 = vrot.slane %v262_v45, 7  ;;  %v2964_v31 = vld [vmem:[#allocation2 + $0xd8] sm:$0xff]   ;;  %v2965_v32 = vld [vmem:[#allocation2 + $0x170] sm:$0xff]   ;;  %v2967_v34 = vld [vmem:[#allocation2 + $0xe0] sm:$0xff]  }
  0x38   : > { %2530 = vmatpush3.bf16.msra.mxu0 %v2937_v10  ;;  %v312_v59 = vrot.slane %v263_v47, 1  ;;  %v277_v60 = vrot.slane %v261_v40, 7  ;;  %v317_v61 = vsel %vm314_vm1, %v310_v44, %v311_v56  ;;  %v279_v62 = vrot.slane %v263_v47, 7  ;;  %v2969_v36 = vld [vmem:[#allocation2 + $0x128] sm:$0xff]   ;;  %v2971_v38 = vld [vmem:[#allocation2 + $0x130] sm:$0xff]   ;;  %v2974_v41 = vld [vmem:[#allocation2 + $0xf8] sm:$0xff]  }
  0x39   : > { %2531 = vmatprep.subr.bf16.mxu0 %v2938_v11  ;;  %2799 = vmatprep.mubr.bf16.mxu1 %v333_v50  ;;  %v336_v63 = vpack.c.bf16 %v318_v53, %v319_v54  ;;  %v286_v3 = vsel %vm281_vm0, %v275_v51, %v276_v55  ;;  %v287_v4 = vsel %vm281_vm0, %v274_v29, %v275_v51  ;;  %v2962_v29 = vld [vmem:[#allocation2 + $0x168] sm:$0xff]   ;;  %v2972_v39 = vld [vmem:[#allocation2 + $0xf0] sm:$0xff]   ;;  %v3265_v44 = vld [vmem:[%s3421_s2] ss:$0 sm:$0xff]  ;;  %vm2249_vm3 = vcmask 1041408  }
  0x3a   : > { %2790 = vmatpush3.bf16.msra.mxu1 %v2939_v12  ;;  %v316_v0 = vsel %vm314_vm1, %v311_v56, %v312_v59  ;;  %v334_v5 = vpack.c.bf16 %v286_v3, %v287_v4  ;;  %v315_v6 = vsel %vm314_vm1, %v312_v59, %v313_v48  ;;  %v322_v7 = vsel %vm314_vm1, %v313_v48, %v306_v30  ;;  %v2963_v30 = vld [vmem:[#allocation2 + $0x118] sm:$0xff]   ;;  %v2970_v37 = vld [vmem:[#allocation2 + $0xe8] sm:$0xff]   ;;  %vm2431_vm11 = vmpackc.low %vm3094_vm4, %vm680_vm9 }
  0x3b   : > { %2791 = vmatprep.subr.bf16.mxu1 %v2942_v14  ;;  %v339_v1 = vpack.c.bf16 %v316_v0, %v317_v61  ;;  %v338_v8 = vpack.c.bf16 %v262_v45, %v261_v40  ;;  %v2403_v9 = vpack.c.bf16 %v322_v7, %v315_v6  ;;  %v284_v10 = vsel %vm281_vm0, %v277_v60, %v278_v58  ;;  %v2973_v40 = vld [vmem:[#allocation2 + $0x138] sm:$0xff]   ;;  %vm2434_vm12 = vmpackc.low %vm720_vm10, %vm3094_vm4  ;;  %v3003_v19 = vld [vmem:[#allocation2 + $0x290] sm:$0xff]  }
  0x3c   : > { %2532 = vmatpush3.bf16.msra.mxu0 %v2940_v13  ;;  %v285_v11 = vsel %vm281_vm0, %v276_v55, %v277_v60  ;;  %v341_v13 = vpack.c.bf16 %v3194_v27, %v263_v47  ;;  %v283_v15 = vsel %vm281_vm0, %v278_v58, %v279_v62  ;;  %v2960_v27 = vld [vmem:[#allocation2 + $0x110] sm:$0xff]   ;;  %vm2466_vm1 = vmpackc.low %vm1137_vm15, %vm3094_vm4 }
  0x3d   : > { %2533 = vmatprep.subr.bf16.mxu0 %v2941_v16  ;;  %v337_v12 = vpack.c.bf16 %v284_v10, %v285_v11 }
  0x3e   : > { %2792 = vmatpush3.bf16.msra.mxu1 %v2942_v14  ;;  %v282_v14 = vsel %vm281_vm0, %v279_v62, %v280_v33  ;;  %v2966_v33 = vld [vmem:[#allocation2 + $0x120] sm:$0xff]   ;;  %vm2463_vm0 = vmpackc.low %vm3094_vm4, %vm1097_vm14  ;;  %vm2259_vm4 = vcmask 1040384  }
  0x3f   : > { %2793 = vmatprep.subr.bf16.mxu1 %v2945_v18  ;;  %v340_v16 = vpack.c.bf16 %v282_v14, %v283_v15 }
  0x40   : > { %2534 = vmatpush3.bf16.msra.mxu0 %v2943_v17  ;;  %v2952_v17 = vld [vmem:[#allocation2 + $0x148] sm:$0xff]  }
  0x41   : > { %2535 = vmatprep.subr.bf16.mxu0 %v2944_v20  ;;  %v2954_v20 = vld [vmem:[#allocation2 + $0x100] sm:$0xff]  }
  0x42   : > { %2794 = vmatpush3.bf16.msra.mxu1 %v2945_v18  ;;  %v2953_v18 = vld [vmem:[#allocation2 + $0x150] sm:$0xff]  }
  0x43   : > { %2795 = vmatprep.subr.bf16.mxu1 %v2948_v23 }
  0x44   : > { %2536 = vmatpush3.bf16.msra.mxu0 %v2946_v21  ;;  %v2955_v21 = vld [vmem:[#allocation2 + $0xc0] sm:$0xff]  }
  0x45   : > { %2537 = vmatprep.subr.bf16.mxu0 %v2947_v22  ;;  %v2956_v22 = vld [vmem:[#allocation2 + $0x158] sm:$0xff]  }
  0x46   : > { %2796 = vmatpush3.bf16.msra.mxu1 %v2948_v23  ;;  %v2957_v23 = vld [vmem:[#allocation2 + $0x108] sm:$0xff]  }
  0x47   : > { %2797 = vmatprep.subr.bf16.mxu1 %v2950_v42 }
  0x48   : > { %2538 = vmatpush3.bf16.msra.mxu0 %v2949_v35  ;;  %v2968_v35 = vld [vmem:[#allocation2 + $0x178] sm:$0xff]  }
  0x49   : > { %2575 = vmatprep.subr.bf16.mxu0 %v2954_v20 }
  0x4a   : > { %2798 = vmatpush3.bf16.msra.mxu1 %v2950_v42 }
  0x4b   : > { %2401 = vmatmul.mubr.msk.bf16.vlgmr.msra.gmra.mrb[0].mxu0 %vm2399_vm5, %v2400_v49  ;;  %2807 = vmatprep.subr.bf16.mxu1 %v2951_v52 }
  0x4c   : > { %582 = vmatprep.mubr.bf16.mxu0 %v335_v57  ;;  %2576 = vmatpush3.bf16.msra.mxu0 %v2955_v21 }
  0x4d   : > { %2800 = vmatmul.mubr.bf16.vlgmr.msra.gmra.mrb[0].mxu1 %v336_v63  ;;  %2577 = vmatprep.subr.bf16.mxu0 %v2957_v23 }
  0x4e   : > { %2803 = vmatprep.mubr.bf16.mxu1 %v339_v1  ;;  %2808 = vmatpush3.bf16.msra.mxu1 %v2951_v52 }
  0x4f   : > { %2809 = vmatprep.subr.bf16.mxu1 %v2952_v17 }
  0x50   : > { %2578 = vmatpush3.bf16.msra.mxu0 %v2958_v25 }
  0x51   : > { %2579 = vmatprep.subr.bf16.mxu0 %v2960_v27 }
  0x52   : > { %2810 = vmatpush3.bf16.msra.mxu1 %v2952_v17 }
  0x53   : > { %583 = vmatmul.mubr.bf16.gmra.mrb[4].mxu0 %v334_v5  ;;  %2811 = vmatprep.subr.bf16.mxu1 %v2953_v18 }
  0x54   : > { %590 = vmatprep.mubr.bf16.mxu0 %v338_v8  ;;  %2580 = vmatpush3.bf16.msra.mxu0 %v2961_v28 }
  0x55   : > { %2804 = vmatmul.mubr.msk.bf16.gmra.mrb[4].mxu1 %vm3237_vm6, %v2403_v9  ;;  %2581 = vmatprep.subr.bf16.mxu0 %v2963_v30 }
  0x56   : > { %2812 = vmatpush3.bf16.msra.mxu1 %v2953_v18 }
  0x57   : > { %2813 = vmatprep.subr.bf16.mxu1 %v2956_v22 }
  0x58   : > { %2582 = vmatpush3.bf16.msra.mxu0 %v2964_v31 }
  0x59   : > { %2583 = vmatprep.subr.bf16.mxu0 %v2966_v33 }
  0x5a   : > { %2814 = vmatpush3.bf16.msra.mxu1 %v2956_v22 }
  0x5b   : > { %591 = vmatmul.mubr.bf16.gmra.mrb[8].mxu0 %v337_v12  ;;  %2815 = vmatprep.subr.bf16.mxu1 %v2959_v26 }
  0x5c   : > { %598 = vmatprep.mubr.bf16.mxu0 %v341_v13  ;;  %2584 = vmatpush3.bf16.msra.mxu0 %v2967_v34 }
  0x5d   : > { %2585 = vmatprep.subr.bf16.mxu0 %v2969_v36 }
  0x5e   : > { %2816 = vmatpush3.bf16.msra.mxu1 %v2959_v26 }
  0x5f   : > { %2817 = vmatprep.subr.bf16.mxu1 %v2962_v29 }
  0x60   : > { %2586 = vmatpush3.bf16.msra.mxu0 %v2970_v37 }
  0x61   : > { %2587 = vmatprep.subr.bf16.mxu0 %v2971_v38 }
  0x62   : > { %2818 = vmatpush3.bf16.msra.mxu1 %v2962_v29 }
  0x63   : > { %599 = vmatmul.mubr.bf16.gmra.mrb[12].mxu0 %v340_v16  ;;  %2819 = vmatprep.subr.bf16.mxu1 %v2965_v32 }
  0x64   : > { %2588 = vmatpush3.bf16.msra.mxu0 %v2972_v39 }
  0x65   : > { %2589 = vmatprep.subr.bf16.mxu0 %v2973_v40 }
  0x66   : > { %2820 = vmatpush3.bf16.msra.mxu1 %v2965_v32 }
  0x67   : > { %2821 = vmatprep.subr.bf16.mxu1 %v2968_v35 }
  0x68   : > { %2590 = vmatpush3.bf16.msra.mxu0 %v2974_v41 }
  0x6a   : > { %2822 = vmatpush3.bf16.msra.mxu1 %v2968_v35 }
 0x11e   : > { %v2539_v42 = vpop.f32.mrb[0].mxu0 }
 0x11f   : > { %v2540_v43 = vpop.f32.mrb[1].mxu0 }
 0x120   : > { %v2541_v45 = vadd.f32 %v2540_v43, %v2539_v42  ;;  %v2542_v46 = vpop.f32.mrb[2].mxu0  ;;  %v2801_v48 = vpop.f32.mrb[0].mxu1 }
 0x121   : > { %v2543_v47 = vpop.f32.mrb[3].mxu0  ;;  %v641_v51 = vpop.f32.mrb[1].mxu1 }
 0x122   : > { %v2544_v49 = vadd.f32 %v2543_v47, %v2542_v46  ;;  %v577_v50 = vadd.f32 %v2541_v45, %v3265_v44  ;;  %v2802_v52 = vpop.f32.mrb[2].mxu1 }
 0x123   : > { %v644_v55 = vpop.f32.mrb[3].mxu1 }
 0x124   : > { %v642_v53 = vadd.f32 %v641_v51, %v577_v50  ;;  %v580_v54 = vadd.f32 %v2544_v49, %v3265_v44 }
 0x126   : > { %v3269_v56 = vmax.f32 %v642_v53, 0.0  ;;  %v645_v57 = vadd.f32 %v644_v55, %v580_v54  ;;  %v2545_v58 = vpop.f32.mrb[4].mxu0 }
 0x127   : > { %v2546_v59 = vpop.f32.mrb[5].mxu0 }
 0x128   : > { %v673_v60 = vmax.f32 %v645_v57, 0.0  ;;  %v2547_v61 = vadd.f32 %v2546_v59, %v2545_v58  ;;  %v2548_v62 = vpop.f32.mrb[6].mxu0  ;;  %v688_v63 = vrot.slane %v3269_v56, 6  ;;  %v721_v0 = vrot.slane %v3269_v56, 2  ;;  %v2805_v2 = vpop.f32.mrb[4].mxu1 }
 0x129   : > { %v2549_v1 = vpop.f32.mrb[7].mxu0  ;;  %v657_v7 = vpop.f32.mrb[5].mxu1 }
 0x12a   : > { %v689_v3 = vrot.slane %v673_v60, 6  ;;  %v722_v4 = vrot.slane %v673_v60, 2  ;;  %v585_v5 = vadd.f32 %v2547_v61, %v3265_v44  ;;  %v2550_v6 = vadd.f32 %v2549_v1, %v2548_v62  ;;  %v2806_v9 = vpop.f32.mrb[6].mxu1 }
 0x12b   : > { %v747_v8 = vpack.c.bf16 %v673_v60, %v3269_v56  ;;  %v660_v13 = vpop.f32.mrb[7].mxu1  ;;  %v2975_v56 = vld [vmem:[#allocation2 + $0x200] sm:$0xff]  }
 0x12c   : > { %v3281_v10 = vsel %vm696_vm7, %v688_v63, %v689_v3  ;;  %v650_v11 = vadd.f32 %v2801_v48, %v585_v5  ;;  %v588_v12 = vadd.f32 %v2550_v6, %v3265_v44  ;;  %v736_v14 = vsel %vm729_vm8, %v721_v0, %v722_v4  ;;  %2831 = vmatprep.subr.bf16.mxu1 %v2975_v56 }
 0x12d   : > { %991 = vmatprep.mubr.bf16.mxu0 %v747_v8 }
 0x12e   : > { %v3288_v15 = vmax.f32 %v650_v11, 0.0  ;;  %v653_v16 = vadd.f32 %v2802_v52, %v588_v12  ;;  %v2551_v17 = vpop.f32.mrb[8].mxu0 }
 0x12f   : > { %v2552_v18 = vpop.f32.mrb[9].mxu0 }
 0x130   : > { %v3290_v20 = vmax.f32 %v653_v16, 0.0  ;;  %v2553_v21 = vadd.f32 %v2552_v18, %v2551_v17  ;;  %v2554_v22 = vpop.f32.mrb[10].mxu0  ;;  %v723_v23 = vrot.slane %v3288_v15, 2  ;;  %v690_v25 = vrot.slane %v3288_v15, 6 }
 0x131   : > { %v2555_v26 = vpop.f32.mrb[11].mxu0 }
 0x132   : > { %v724_v27 = vrot.slane %v3290_v20, 2  ;;  %v2556_v28 = vadd.f32 %v2555_v26, %v2554_v22  ;;  %v593_v29 = vadd.f32 %v2553_v21, %v3265_v44  ;;  %v735_v30 = vsel %vm729_vm8, %v722_v4, %v723_v23  ;;  %v2978_v22 = vld [vmem:[#allocation2 + $0x1c0] sm:$0xff]   ;;  %v2982_v26 = vld [vmem:[#allocation2 + $0x188] sm:$0xff]  }
 0x133   : > { %v748_v31 = vpack.c.bf16 %v735_v30, %v736_v14  ;;  %v750_v32 = vpack.c.bf16 %v3290_v20, %v3288_v15  ;;  %v691_v33 = vrot.slane %v3290_v20, 6  ;;  %v702_v34 = vsel %vm696_vm7, %v689_v3, %v690_v25  ;;  %2627 = vmatprep.subr.bf16.mxu0 %v2978_v22  ;;  %v2986_v30 = vld [vmem:[#allocation2 + $0x228] sm:$0xff]  }
 0x134   : > { %v658_v35 = vadd.f32 %v657_v7, %v593_v29  ;;  %v596_v36 = vadd.f32 %v2556_v28, %v3265_v44  ;;  %v734_v37 = vsel %vm729_vm8, %v723_v23, %v724_v27  ;;  %v2980_v23 = vld [vmem:[#allocation2 + $0x218] sm:$0xff]   ;;  %v2984_v28 = vld [vmem:[#allocation2 + $0x1d0] sm:$0xff]  }
 0x135   : > { %2823 = vmatprep.mubr.bf16.mxu1 %v748_v31  ;;  %v701_v38 = vsel %vm696_vm7, %v690_v25, %v691_v33  ;;  %v2981_v25 = vld [vmem:[#allocation2 + $0x1c8] sm:$0xff]   ;;  %v2985_v29 = vld [vmem:[#allocation2 + $0x190] sm:$0xff]   ;;  %v2987_v31 = vld [vmem:[#allocation2 + $0x1d8] sm:$0xff]  }
 0x136   : > { %v676_v39 = vmax.f32 %v658_v35, 0.0  ;;  %v661_v40 = vadd.f32 %v660_v13, %v596_v36  ;;  %v2557_v41 = vpop.f32.mrb[12].mxu0  ;;  %v749_v42 = vpack.c.bf16 %v701_v38, %v702_v34  ;;  %v2990_v34 = vld [vmem:[#allocation2 + $0x1e0] sm:$0xff]   ;;  %v2992_v36 = vld [vmem:[#allocation2 + $0x238] sm:$0xff]   ;;  %v2994_v38 = vld [vmem:[#allocation2 + $0x1a8] sm:$0xff]  }
 0x137   : > { %v2558_v43 = vpop.f32.mrb[13].mxu0  ;;  %v2991_v35 = vld [vmem:[#allocation2 + $0x1a0] sm:$0xff]  }
 0x138   : > { %v692_v45 = vrot.slane %v676_v39, 6  ;;  %v725_v46 = vrot.slane %v676_v39, 2  ;;  %v677_v47 = vmax.f32 %v661_v40, 0.0  ;;  %v2559_v48 = vadd.f32 %v2558_v43, %v2557_v41  ;;  %v2560_v49 = vpop.f32.mrb[14].mxu0  ;;  %v2996_v40 = vld [vmem:[#allocation2 + $0x1b0] sm:$0xff]   ;;  %v2997_v41 = vld [vmem:[#allocation2 + $0x1f8] sm:$0xff]  }
 0x139   : > { %v2561_v50 = vpop.f32.mrb[15].mxu0  ;;  %v2999_v43 = vld [vmem:[#allocation2 + $0x280] sm:$0xff]  }
 0x13a   : > { %v733_v51 = vsel %vm729_vm8, %v724_v27, %v725_v46  ;;  %v693_v52 = vrot.slane %v677_v47, 6  ;;  %v726_v53 = vrot.slane %v677_v47, 2  ;;  %v601_v54 = vadd.f32 %v2559_v48, %v3265_v44  ;;  %v2983_v27 = vld [vmem:[#allocation2 + $0x220] sm:$0xff]  }
 0x13b   : > { %v2562_v55 = vadd.f32 %v2561_v50, %v2560_v49  ;;  %v751_v57 = vpack.c.bf16 %v733_v51, %v734_v37  ;;  %v753_v58 = vpack.c.bf16 %v677_v47, %v676_v39  ;;  %v700_v59 = vsel %vm696_vm7, %v691_v33, %v692_v45  ;;  %v2989_v33 = vld [vmem:[#allocation2 + $0x230] sm:$0xff]   ;;  %v2993_v37 = vld [vmem:[#allocation2 + $0x1e8] sm:$0xff]   ;;  %v3344_v51 = vld [vmem:[%s3421_s2 + $0x1] ss:$0 sm:$0xff] }
 0x13c   : > { %v666_v60 = vadd.f32 %v2805_v2, %v601_v54  ;;  %v732_v61 = vsel %vm729_vm8, %v725_v46, %v726_v53  ;;  %v699_v62 = vsel %vm696_vm7, %v692_v45, %v693_v52  ;;  %v2995_v39 = vld [vmem:[#allocation2 + $0x1f0] sm:$0xff]  }
 0x13d   : > { %v604_v1 = vadd.f32 %v2562_v55, %v3265_v44  ;;  %2824 = vmatmul.mubr.bf16.vlgmr.msra.gmra.mrb[8].mxu1 %v751_v57  ;;  %v752_v3 = vpack.c.bf16 %v699_v62, %v700_v59 }
 0x13e   : > { %v678_v4 = vmax.f32 %v666_v60, 0.0  ;;  %2832 = vmatpush3.bf16.msra.mxu1 %v2975_v56 }
 0x13f   : > { %v669_v5 = vadd.f32 %v2806_v9, %v604_v1 }
 0x140   : > { %v727_v6 = vrot.slane %v678_v4, 2  ;;  %v694_v7 = vrot.slane %v678_v4, 6 }
 0x141   : > { %v679_v8 = vmax.f32 %v669_v5, 0.0 }
 0x142   : > { %v731_v2 = vsel %vm729_vm8, %v726_v53, %v727_v6  ;;  %v698_v11 = vsel %vm696_vm7, %v693_v52, %v694_v7 }
 0x143   : > { %v695_v12 = vrot.slane %v679_v8, 6  ;;  %v728_v13 = vrot.slane %v679_v8, 2  ;;  %v754_v44 = vpack.c.bf16 %v731_v2, %v732_v61  ;;  %v756_v14 = vpack.c.bf16 %v679_v8, %v678_v4 }
 0x145   : > { %v704_v9 = vsel %vm696_vm7, %v695_v12, %v688_v63  ;;  %2827 = vmatprep.mubr.bf16.mxu1 %v754_v44  ;;  %v730_v15 = vsel %vm729_vm8, %v727_v6, %v728_v13  ;;  %v737_v16 = vsel %vm729_vm8, %v728_v13, %v721_v0  ;;  %v697_v17 = vsel %vm696_vm7, %v694_v7, %v695_v12  ;;  %v2976_v63 = vld [vmem:[#allocation2 + $0x208] sm:$0xff]   ;;  %v2977_v0 = vld [vmem:[#allocation2 + $0x210] sm:$0xff]  }
 0x146   : > { %v2432_v18 = vpack.c.bf16 %v3281_v10, %v704_v9  ;;  %v2435_v20 = vpack.c.bf16 %v737_v16, %v730_v15  ;;  %v755_v21 = vpack.c.bf16 %v697_v17, %v698_v11  ;;  %2833 = vmatprep.subr.bf16.mxu1 %v2976_v63  ;;  %v2979_v10 = vld [vmem:[#allocation2 + $0x180] sm:$0xff]  }
 0x147   : > { %2834 = vmatpush3.bf16.msra.mxu1 %v2976_v63 }
 0x148   : > { %2433 = vmatmul.mubr.msk.bf16.vlgmr.msra.gmra.mrb[16].mxu0 %vm2431_vm11, %v2432_v18  ;;  %2828 = vmatmul.mubr.msk.bf16.gmra.mrb[12].mxu1 %vm2434_vm12, %v2435_v20 }
 0x149   : > { %999 = vmatprep.mubr.bf16.mxu0 %v750_v32  ;;  %2835 = vmatprep.subr.bf16.mxu1 %v2977_v0  ;;  %v2988_v32 = vld [vmem:[#allocation2 + $0x198] sm:$0xff]  }
 0x14a   : > { %2628 = vmatpush3.bf16.msra.mxu0 %v2979_v10 }
 0x14b   : > { %2836 = vmatpush3.bf16.msra.mxu1 %v2977_v0  ;;  %2629 = vmatprep.subr.bf16.mxu0 %v2981_v25 }
 0x14c   : > { %2837 = vmatprep.subr.bf16.mxu1 %v2980_v23 }
 0x14e   : > { %2630 = vmatpush3.bf16.msra.mxu0 %v2982_v26 }
 0x14f   : > { %2838 = vmatpush3.bf16.msra.mxu1 %v2980_v23  ;;  %2631 = vmatprep.subr.bf16.mxu0 %v2984_v28 }
 0x150   : > { %1000 = vmatmul.mubr.bf16.gmra.mrb[20].mxu0 %v749_v42  ;;  %2839 = vmatprep.subr.bf16.mxu1 %v2983_v27  ;;  %v2998_v42 = vld [vmem:[#allocation2 + $0x1b8] sm:$0xff]  }
 0x151   : > { %1007 = vmatprep.mubr.bf16.mxu0 %v753_v58 }
 0x152   : > { %2632 = vmatpush3.bf16.msra.mxu0 %v2985_v29 }
 0x153   : > { %2840 = vmatpush3.bf16.msra.mxu1 %v2983_v27  ;;  %2633 = vmatprep.subr.bf16.mxu0 %v2987_v31 }
 0x154   : > { %2841 = vmatprep.subr.bf16.mxu1 %v2986_v30 }
 0x156   : > { %2634 = vmatpush3.bf16.msra.mxu0 %v2988_v32 }
 0x157   : > { %2842 = vmatpush3.bf16.msra.mxu1 %v2986_v30  ;;  %2635 = vmatprep.subr.bf16.mxu0 %v2990_v34 }
 0x158   : > { %1008 = vmatmul.mubr.bf16.gmra.mrb[24].mxu0 %v752_v3  ;;  %2843 = vmatprep.subr.bf16.mxu1 %v2989_v33 }
 0x159   : > { %1015 = vmatprep.mubr.bf16.mxu0 %v756_v14 }
 0x15a   : > { %2636 = vmatpush3.bf16.msra.mxu0 %v2991_v35 }
 0x15b   : > { %2844 = vmatpush3.bf16.msra.mxu1 %v2989_v33  ;;  %2637 = vmatprep.subr.bf16.mxu0 %v2993_v37 }
 0x15c   : > { %2845 = vmatprep.subr.bf16.mxu1 %v2992_v36 }
 0x15e   : > { %2638 = vmatpush3.bf16.msra.mxu0 %v2994_v38 }
 0x15f   : > { %2846 = vmatpush3.bf16.msra.mxu1 %v2992_v36  ;;  %2639 = vmatprep.subr.bf16.mxu0 %v2995_v39 }
 0x160   : > { %1016 = vmatmul.mubr.bf16.gmra.mrb[28].mxu0 %v755_v21 }
 0x162   : > { %2640 = vmatpush3.bf16.msra.mxu0 %v2996_v40 }
 0x163   : > { %2641 = vmatprep.subr.bf16.mxu0 %v2997_v41 }
 0x166   : > { %2642 = vmatpush3.bf16.msra.mxu0 %v2998_v42 }
 0x167   : > { %2679 = vmatprep.subr.bf16.mxu0 %v2999_v43 }
 0x210   : > { %v2825_v45 = vpop.f32.mrb[8].mxu1 }
 0x211   : > { %v1058_v46 = vpop.f32.mrb[9].mxu1 }
 0x212   : > { %v2826_v47 = vpop.f32.mrb[10].mxu1 }
 0x213   : > { %v1061_v48 = vpop.f32.mrb[11].mxu1 }
 0x21b   : > { %v2591_v49 = vpop.f32.mrb[16].mxu0  ;;  %v3339_v50 = vpop.f32.mrb[12].mxu1 }
 0x21c   : > { %v2592_v52 = vpop.f32.mrb[17].mxu0  ;;  %v1074_v53 = vpop.f32.mrb[13].mxu1 }
 0x21d   : > { %v2593_v54 = vadd.f32 %v2592_v52, %v2591_v49  ;;  %v2594_v55 = vpop.f32.mrb[18].mxu0  ;;  %v3346_v57 = vpop.f32.mrb[14].mxu1 }
 0x21e   : > { %v2595_v58 = vpop.f32.mrb[19].mxu0  ;;  %v1077_v59 = vpop.f32.mrb[15].mxu1 }
 0x21f   : > { %v994_v60 = vadd.f32 %v2593_v54, %v3344_v51  ;;  %v2596_v61 = vadd.f32 %v2595_v58, %v2594_v55 }
 0x221   : > { %v1059_v62 = vadd.f32 %v1058_v46, %v994_v60  ;;  %v997_v1 = vadd.f32 %v2596_v61, %v3344_v51 }
 0x223   : > { %v1089_v3 = vmax.f32 %v1059_v62, 0.0  ;;  %v1062_v4 = vadd.f32 %v1061_v48, %v997_v1  ;;  %v2597_v5 = vpop.f32.mrb[20].mxu0 }
 0x224   : > { %v2598_v6 = vpop.f32.mrb[21].mxu0 }
 0x225   : > { %v1090_v7 = vmax.f32 %v1062_v4, 0.0  ;;  %v2599_v8 = vadd.f32 %v2598_v6, %v2597_v5  ;;  %v2600_v2 = vpop.f32.mrb[22].mxu0  ;;  %v3350_v11 = vrot.slane %v1089_v3, 4  ;;  %v3000_v5 = vld [vmem:[#allocation2 + $0x240] sm:$0xff]  }
 0x226   : > { %v2601_v12 = vpop.f32.mrb[23].mxu0 }
 0x227   : > { %v1106_v13 = vrot.slane %v1090_v7, 4  ;;  %v1002_v44 = vadd.f32 %v2599_v8, %v3344_v51  ;;  %v2602_v14 = vadd.f32 %v2601_v12, %v2600_v2  ;;  %v1147_v9 = vpack.c.bf16 %v1090_v7, %v1089_v3  ;;  %v3001_v8 = vld [vmem:[#allocation2 + $0x288] sm:$0xff]   ;;  %v3005_v12 = vld [vmem:[#allocation2 + $0x298] sm:$0xff]  }
 0x228   : > { %v3002_v2 = vld [vmem:[#allocation2 + $0x248] sm:$0xff]  }
 0x229   : > { %v1067_v15 = vadd.f32 %v2825_v45, %v1002_v44  ;;  %v1005_v16 = vadd.f32 %v2602_v14, %v3344_v51  ;;  %1391 = vmatprep.mubr.bf16.mxu0 %v1147_v9  ;;  %v1120_v17 = vsel %vm1113_vm13, %v3350_v11, %v1106_v13  ;;  %v3007_v44 = vld [vmem:[#allocation2 + $0x2c0] sm:$0xff]  }
 0x22a   : > { %v3008_v14 = vld [vmem:[#allocation2 + $0x2a0] sm:$0xff]   ;;  %2855 = vmatprep.subr.bf16.mxu1 %v3007_v44 }
 0x22b   : > { %v1091_v18 = vmax.f32 %v1067_v15, 0.0  ;;  %v1070_v20 = vadd.f32 %v2826_v47, %v1005_v16  ;;  %v2603_v21 = vpop.f32.mrb[24].mxu0  ;;  %v3009_v9 = vld [vmem:[#allocation2 + $0x260] sm:$0xff]   ;;  %v3010_v15 = vld [vmem:[#allocation2 + $0x2c8] sm:$0xff]  }
 0x22c   : > { %v2604_v56 = vpop.f32.mrb[25].mxu0  ;;  %v3011_v16 = vld [vmem:[#allocation2 + $0x2a8] sm:$0xff]  }
 0x22d   : > { %v1107_v63 = vrot.slane %v1091_v18, 4  ;;  %v1092_v0 = vmax.f32 %v1070_v20, 0.0  ;;  %v2605_v22 = vadd.f32 %v2604_v56, %v2603_v21  ;;  %v2606_v10 = vpop.f32.mrb[26].mxu0  ;;  %v3014_v20 = vld [vmem:[#allocation2 + $0x2b0] sm:$0xff]   ;;  %v3016_v56 = vld [vmem:[#allocation2 + $0x2d8] sm:$0xff]  }
 0x22e   : > { %v2607_v23 = vpop.f32.mrb[27].mxu0  ;;  %v3015_v21 = vld [vmem:[#allocation2 + $0x270] sm:$0xff]  }
 0x22f   : > { %v1108_v25 = vrot.slane %v1092_v0, 4  ;;  %v1010_v26 = vadd.f32 %v2605_v22, %v3344_v51  ;;  %v2608_v27 = vadd.f32 %v2607_v23, %v2606_v10  ;;  %v1119_v28 = vsel %vm1113_vm13, %v1106_v13, %v1107_v63  ;;  %v3006_v13 = vld [vmem:[#allocation2 + $0x258] sm:$0xff]   ;;  %v3019_v22 = vld [vmem:[#allocation2 + $0x2e0] sm:$0xff]   ;;  %v3020_v10 = vld [vmem:[#allocation2 + $0x2e8] sm:$0xff]  }
 0x230   : > { %v1148_v29 = vpack.c.bf16 %v1119_v28, %v1120_v17  ;;  %v1150_v30 = vpack.c.bf16 %v1092_v0, %v1091_v18  ;;  %v3013_v18 = vld [vmem:[#allocation2 + $0x2d0] sm:$0xff]   ;;  %v3018_v0 = vld [vmem:[#allocation2 + $0x278] sm:$0xff]  }
 0x231   : > { %v1118_v31 = vsel %vm1113_vm13, %v1107_v63, %v1108_v25  ;;  %v1075_v32 = vadd.f32 %v1074_v53, %v1010_v26  ;;  %v1013_v33 = vadd.f32 %v2608_v27, %v3344_v51  ;;  %v3017_v63 = vld [vmem:[#allocation2 + $0x2b8] sm:$0xff]   ;;  %v3021_v23 = vld [vmem:[#allocation2 + $0x2f0] sm:$0xff]   ;;  %v3023_v26 = vld [vmem:[#allocation2 + $0x340] sm:$0xff]  }
 0x232   : > { %2847 = vmatprep.mubr.bf16.mxu1 %v1148_v29  ;;  %v1149_v34 = vpack.c.bf16 %v1118_v31, %v1119_v28 }
 0x233   : > { %v1093_v35 = vmax.f32 %v1075_v32, 0.0  ;;  %v1078_v36 = vadd.f32 %v1077_v59, %v1013_v33  ;;  %v2609_v37 = vpop.f32.mrb[28].mxu0  ;;  %v3388_v33 = vld [vmem:[%s3421_s2 + $0x2] ss:$0 sm:$0xff] }
 0x234   : > { %v2610_v38 = vpop.f32.mrb[29].mxu0 }
 0x235   : > { %v1109_v39 = vrot.slane %v1093_v35, 4  ;;  %v1094_v40 = vmax.f32 %v1078_v36, 0.0  ;;  %v2611_v41 = vadd.f32 %v2610_v38, %v2609_v37  ;;  %v2612_v42 = vpop.f32.mrb[30].mxu0 }
 0x236   : > { %v2613_v43 = vpop.f32.mrb[31].mxu0 }
 0x237   : > { %v1117_v45 = vsel %vm1113_vm13, %v1108_v25, %v1109_v39  ;;  %v1110_v46 = vrot.slane %v1094_v40, 4  ;;  %v1018_v47 = vadd.f32 %v2611_v41, %v3344_v51  ;;  %v2614_v48 = vadd.f32 %v2613_v43, %v2612_v42  ;;  %v3022_v25 = vld [vmem:[#allocation2 + $0x2f8] sm:$0xff]  }
 0x238   : > { %v1151_v49 = vpack.c.bf16 %v1117_v45, %v1118_v31  ;;  %v1153_v52 = vpack.c.bf16 %v1094_v40, %v1093_v35 }
 0x239   : > { %v1083_v53 = vadd.f32 %v3339_v50, %v1018_v47  ;;  %v1021_v54 = vadd.f32 %v2614_v48, %v3344_v51  ;;  %v1116_v55 = vsel %vm1113_vm13, %v1109_v39, %v1110_v46 }
 0x23a   : > { %2848 = vmatmul.mubr.bf16.vlgmr.msra.gmra.mrb[16].mxu1 %v1151_v49  ;;  %v1152_v58 = vpack.c.bf16 %v1116_v55, %v1117_v45 }
 0x23b   : > { %v1095_v59 = vmax.f32 %v1083_v53, 0.0  ;;  %v1086_v60 = vadd.f32 %v3346_v57, %v1021_v54  ;;  %2856 = vmatpush3.bf16.msra.mxu1 %v3007_v44 }
 0x23c   : > { %2857 = vmatprep.subr.bf16.mxu1 %v3010_v15 }
 0x23d   : > { %v1111_v61 = vrot.slane %v1095_v59, 4  ;;  %v1096_v62 = vmax.f32 %v1086_v60, 0.0 }
 0x23f   : > { %v1112_v1 = vrot.slane %v1096_v62, 4  ;;  %v1115_v50 = vsel %vm1113_vm13, %v1110_v46, %v1111_v61  ;;  %v1156_v3 = vpack.c.bf16 %v1096_v62, %v1095_v59  ;;  %2858 = vmatpush3.bf16.msra.mxu1 %v3010_v15  ;;  %v3095_v62 = vmov 0.0  }
 0x240   : > { %v1154_v51 = vpack.c.bf16 %v1115_v50, %v1116_v55  ;;  %2859 = vmatprep.subr.bf16.mxu1 %v3013_v18 }
 0x241   : > { %v1121_v4 = vsel %vm1113_vm13, %v1112_v1, %v3350_v11  ;;  %v1114_v57 = vsel %vm1113_vm13, %v1111_v61, %v1112_v1  ;;  %v3004_v11 = vld [vmem:[#allocation2 + $0x250] sm:$0xff]   ;;  %v3024_v61 = vld [vmem:[#allocation2 + $0x300] sm:$0xff]  }
 0x242   : > { %v2464_v6 = vpack.c.bf16 %v1120_v17, %v1121_v4  ;;  %2851 = vmatprep.mubr.bf16.mxu1 %v1154_v51  ;;  %v2467_v24 = vpack.c.bf16 %v1121_v4, %v1114_v57  ;;  %v1155_v7 = vpack.c.bf16 %v1114_v57, %v1115_v50  ;;  %v3012_v17 = vld [vmem:[#allocation2 + $0x268] sm:$0xff]  }
 0x243   : > { %2860 = vmatpush3.bf16.msra.mxu1 %v3013_v18  ;;  %v3025_v50 = vld [vmem:[#allocation2 + $0x348] sm:$0xff]  }
 0x244   : > { %2465 = vmatmul.mubr.msk.bf16.vlgmr.msra.gmra.mrb[32].mxu0 %vm2463_vm0, %v2464_v6  ;;  %2852 = vmatmul.mubr.msk.bf16.gmra.mrb[20].mxu1 %vm2466_vm1, %v2467_v24  ;;  %v3026_v6 = vld [vmem:[#allocation2 + $0x308] sm:$0xff]  }
 0x245   : > { %1399 = vmatprep.mubr.bf16.mxu0 %v1150_v30  ;;  %2680 = vmatpush3.bf16.msra.mxu0 %v3000_v5 }
 0x246   : > { %2681 = vmatprep.subr.bf16.mxu0 %v3001_v8  ;;  %2861 = vmatprep.subr.bf16.mxu1 %v3016_v56 }
 0x247   : > { %2862 = vmatpush3.bf16.msra.mxu1 %v3016_v56 }
 0x248   : > { %2863 = vmatprep.subr.bf16.mxu1 %v3019_v22 }
 0x249   : > { %2682 = vmatpush3.bf16.msra.mxu0 %v3002_v2 }
 0x24a   : > { %2683 = vmatprep.subr.bf16.mxu0 %v3003_v19 }
 0x24b   : > { %2864 = vmatpush3.bf16.msra.mxu1 %v3019_v22 }
 0x24c   : > { %1400 = vmatmul.mubr.bf16.gmra.mrb[36].mxu0 %v1149_v34  ;;  %2865 = vmatprep.subr.bf16.mxu1 %v3020_v10 }
 0x24d   : > { %1407 = vmatprep.mubr.bf16.mxu0 %v1153_v52  ;;  %2684 = vmatpush3.bf16.msra.mxu0 %v3004_v11 }
 0x24e   : > { %2685 = vmatprep.subr.bf16.mxu0 %v3005_v12 }
 0x24f   : > { %2866 = vmatpush3.bf16.msra.mxu1 %v3020_v10 }
 0x250   : > { %2867 = vmatprep.subr.bf16.mxu1 %v3021_v23 }
 0x251   : > { %2686 = vmatpush3.bf16.msra.mxu0 %v3006_v13 }
 0x252   : > { %2687 = vmatprep.subr.bf16.mxu0 %v3008_v14 }
 0x253   : > { %2868 = vmatpush3.bf16.msra.mxu1 %v3021_v23 }
 0x254   : > { %1408 = vmatmul.mubr.bf16.gmra.mrb[40].mxu0 %v1152_v58  ;;  %2869 = vmatprep.subr.bf16.mxu1 %v3022_v25 }
 0x255   : > { %1415 = vmatprep.mubr.bf16.mxu0 %v1156_v3  ;;  %2688 = vmatpush3.bf16.msra.mxu0 %v3009_v9 }
 0x256   : > { %2689 = vmatprep.subr.bf16.mxu0 %v3011_v16 }
 0x257   : > { %2870 = vmatpush3.bf16.msra.mxu1 %v3022_v25 }
 0x259   : > { %2690 = vmatpush3.bf16.msra.mxu0 %v3012_v17 }
 0x25a   : > { %2691 = vmatprep.subr.bf16.mxu0 %v3014_v20 }
 0x25c   : > { %1416 = vmatmul.mubr.bf16.gmra.mrb[44].mxu0 %v1155_v7  ;;  %v3027_v7 = vld [vmem:[#allocation2 + $0x350] sm:$0xff]  }
 0x25d   : > { %2692 = vmatpush3.bf16.msra.mxu0 %v3015_v21 }
 0x25e   : > { %2693 = vmatprep.subr.bf16.mxu0 %v3017_v63 }
 0x261   : > { %2694 = vmatpush3.bf16.msra.mxu0 %v3018_v0 }
 0x262   : > { %2731 = vmatprep.subr.bf16.mxu0 %v3023_v26 }
 0x30d   : > { %v2849_v27 = vpop.f32.mrb[16].mxu1 }
 0x30e   : > { %v1458_v28 = vpop.f32.mrb[17].mxu1 }
 0x30f   : > { %v2850_v29 = vpop.f32.mrb[18].mxu1 }
 0x310   : > { %v1461_v30 = vpop.f32.mrb[19].mxu1 }
 0x317   : > { %v2643_v31 = vpop.f32.mrb[32].mxu0  ;;  %v3383_v32 = vpop.f32.mrb[20].mxu1 }
 0x318   : > { %v2644_v34 = vpop.f32.mrb[33].mxu0  ;;  %v1474_v35 = vpop.f32.mrb[21].mxu1 }
 0x319   : > { %v2645_v36 = vadd.f32 %v2644_v34, %v2643_v31  ;;  %v2646_v37 = vpop.f32.mrb[34].mxu0  ;;  %v3390_v38 = vpop.f32.mrb[22].mxu1 }
 0x31a   : > { %v2647_v39 = vpop.f32.mrb[35].mxu0  ;;  %v1477_v40 = vpop.f32.mrb[23].mxu1 }
 0x31b   : > { %v1394_v41 = vadd.f32 %v2645_v36, %v3388_v33  ;;  %v2648_v42 = vadd.f32 %v2647_v39, %v2646_v37  ;;  %v3028_v36 = vld [vmem:[#allocation2 + $0x310] sm:$0xff]   ;;  %v3029_v37 = vld [vmem:[#allocation2 + $0x380] sm:$0xff]   ;;  %v3032_v39 = vld [vmem:[#allocation2 + $0x388] sm:$0xff]  }
 0x31c   : > { %2879 = vmatprep.subr.bf16.mxu1 %v3029_v37 }
 0x31d   : > { %v1459_v43 = vadd.f32 %v1458_v28, %v1394_v41  ;;  %v1397_v45 = vadd.f32 %v2648_v42, %v3388_v33  ;;  %v3035_v41 = vld [vmem:[#allocation2 + $0x390] sm:$0xff]   ;;  %v3036_v42 = vld [vmem:[#allocation2 + $0x368] sm:$0xff]  }
 0x31f   : > { %v1462_v46 = vadd.f32 %v1461_v30, %v1397_v45  ;;  %v2649_v47 = vpop.f32.mrb[36].mxu0  ;;  %v1489_v48 = vmax.f32 %v1459_v43, 0.0  ;;  %v3037_v43 = vld [vmem:[#allocation2 + $0x328] sm:$0xff]   ;;  %v3038_v45 = vld [vmem:[#allocation2 + $0x398] sm:$0xff]  }
 0x320   : > { %v2650_v49 = vpop.f32.mrb[37].mxu0 }
 0x321   : > { %v1490_v52 = vmax.f32 %v1462_v46, 0.0  ;;  %v2651_v53 = vadd.f32 %v2650_v49, %v2649_v47  ;;  %v2652_v54 = vpop.f32.mrb[38].mxu0  ;;  %v1529_v1 = vpack.c.bf16 %v1489_v48, %v3095_v62  ;;  %v3039_v46 = vld [vmem:[#allocation2 + $0x370] sm:$0xff]   ;;  %v3042_v49 = vld [vmem:[#allocation2 + $0x378] sm:$0xff]  }
 0x322   : > { %v2653_v55 = vpop.f32.mrb[39].mxu0  ;;  %v3040_v47 = vld [vmem:[#allocation2 + $0x330] sm:$0xff]  }
 0x323   : > { %v1402_v58 = vadd.f32 %v2651_v53, %v3388_v33  ;;  %v2654_v59 = vadd.f32 %v2653_v55, %v2652_v54  ;;  %v1530_v60 = vpack.c.bf16 %v1490_v52, %v1489_v48  ;;  %v3041_v48 = vld [vmem:[#allocation2 + $0x3a0] sm:$0xff]   ;;  %v3044_v53 = vld [vmem:[#allocation2 + $0x3a8] sm:$0xff]   ;;  %v3045_v54 = vld [vmem:[#allocation2 + $0x3b0] sm:$0xff]  }
 0x324   : > { %v3046_v55 = vld [vmem:[#allocation2 + $0x3b8] sm:$0xff]  }
 0x325   : > { %v1467_v3 = vadd.f32 %v2849_v27, %v1402_v58  ;;  %v1405_v51 = vadd.f32 %v2654_v59, %v3388_v33  ;;  %1774 = vmatprep.mubr.bf16.mxu0 %v1530_v60 }
 0x326   : > { %1775 = vmatmul.mubr.bf16.vlgmr.msra.gmra.mrb[48].mxu0 %v1529_v1 }
 0x327   : > { %v1491_v4 = vmax.f32 %v1467_v3, 0.0  ;;  %v1470_v57 = vadd.f32 %v2850_v29, %v1405_v51  ;;  %v2655_v5 = vpop.f32.mrb[40].mxu0  ;;  %2732 = vmatpush3.bf16.msra.mxu0 %v3024_v61 }
 0x328   : > { %v2656_v24 = vpop.f32.mrb[41].mxu0  ;;  %2733 = vmatprep.subr.bf16.mxu0 %v3025_v50 }
 0x329   : > { %v1492_v8 = vmax.f32 %v1470_v57, 0.0  ;;  %v2657_v2 = vadd.f32 %v2656_v24, %v2655_v5  ;;  %v2658_v19 = vpop.f32.mrb[42].mxu0  ;;  %v1531_v11 = vpack.c.bf16 %v1491_v4, %v1490_v52  ;;  %v3043_v52 = vld [vmem:[#allocation2 + $0x338] sm:$0xff]   ;;  %v2470_v57 = vld [vmem:[%s3421_s2 + $0x3] ss:$0 sm:$0xff] }
 0x32a   : > { %v2659_v12 = vpop.f32.mrb[43].mxu0 }
 0x32b   : > { %v1410_v13 = vadd.f32 %v2657_v2, %v3388_v33  ;;  %v2660_v44 = vadd.f32 %v2659_v12, %v2658_v19  ;;  %2871 = vmatprep.mubr.bf16.mxu1 %v1531_v11  ;;  %v1533_v14 = vpack.c.bf16 %v1492_v8, %v1491_v4  ;;  %2734 = vmatpush3.bf16.msra.mxu0 %v3026_v6 }
 0x32c   : > { %2735 = vmatprep.subr.bf16.mxu0 %v3027_v7 }
 0x32d   : > { %v1475_v9 = vadd.f32 %v1474_v35, %v1410_v13  ;;  %v1413_v15 = vadd.f32 %v2660_v44, %v3388_v33  ;;  %1782 = vmatprep.mubr.bf16.mxu0 %v1533_v14 }
 0x32e   : > { %1783 = vmatmul.mubr.bf16.gmra.mrb[52].mxu0 %v1531_v11 }
 0x32f   : > { %v1493_v16 = vmax.f32 %v1475_v9, 0.0  ;;  %v1478_v17 = vadd.f32 %v1477_v40, %v1413_v15  ;;  %v2661_v18 = vpop.f32.mrb[44].mxu0  ;;  %2736 = vmatpush3.bf16.msra.mxu0 %v3028_v36  ;;  %v3033_v40 = vld [vmem:[#allocation2 + $0x360] sm:$0xff]  }
 0x330   : > { %v2662_v20 = vpop.f32.mrb[45].mxu0 }
 0x331   : > { %v1534_v21 = vpack.c.bf16 %v1493_v16, %v1492_v8  ;;  %v1494_v56 = vmax.f32 %v1478_v17, 0.0  ;;  %v2663_v63 = vadd.f32 %v2662_v20, %v2661_v18  ;;  %v2664_v0 = vpop.f32.mrb[46].mxu0 }
 0x332   : > { %v2665_v22 = vpop.f32.mrb[47].mxu0 }
 0x333   : > { %v1418_v10 = vadd.f32 %v2663_v63, %v3388_v33  ;;  %v2666_v23 = vadd.f32 %v2665_v22, %v2664_v0  ;;  %2872 = vmatmul.mubr.bf16.vlgmr.msra.gmra.mrb[24].mxu1 %v1534_v21  ;;  %v1536_v25 = vpack.c.bf16 %v1494_v56, %v1493_v16 }
 0x334   : > { %2880 = vmatpush3.bf16.msra.mxu1 %v3029_v37 }
 0x335   : > { %v1483_v26 = vadd.f32 %v3383_v32, %v1418_v10  ;;  %v1421_v27 = vadd.f32 %v2666_v23, %v3388_v33  ;;  %1790 = vmatprep.mubr.bf16.mxu0 %v1536_v25  ;;  %v3030_v32 = vld [vmem:[#allocation2 + $0x358] sm:$0xff]   ;;  %2881 = vmatprep.subr.bf16.mxu1 %v3032_v39 }
 0x336   : > { %1791 = vmatmul.mubr.bf16.gmra.mrb[56].mxu0 %v1534_v21  ;;  %v3031_v33 = vld [vmem:[#allocation2 + $0x318] sm:$0xff]   ;;  %2737 = vmatprep.subr.bf16.mxu0 %v3030_v32 }
 0x337   : > { %v1495_v28 = vmax.f32 %v1483_v26, 0.0  ;;  %v1486_v29 = vadd.f32 %v3390_v38, %v1421_v27  ;;  %2738 = vmatpush3.bf16.msra.mxu0 %v3031_v33  ;;  %v3034_v38 = vld [vmem:[#allocation2 + $0x320] sm:$0xff]  }
 0x338   : > { %2882 = vmatpush3.bf16.msra.mxu1 %v3032_v39  ;;  %2739 = vmatprep.subr.bf16.mxu0 %v3033_v40 }
 0x339   : > { %v1496_v30 = vmax.f32 %v1486_v29, 0.0  ;;  %v1537_v31 = vpack.c.bf16 %v1495_v28, %v1494_v56  ;;  %2883 = vmatprep.subr.bf16.mxu1 %v3035_v41 }
 0x33b   : > { %2875 = vmatprep.mubr.bf16.mxu1 %v1537_v31  ;;  %v1539_v34 = vpack.c.bf16 %v1496_v30, %v1495_v28  ;;  %v1540_v35 = vpack.c.bf16 %v3095_v62, %v1496_v30  ;;  %2740 = vmatpush3.bf16.msra.mxu0 %v3034_v38  ;;  %v3096_v30 = vmov 0.0|0.0  }
 0x33c   : > { %2884 = vmatpush3.bf16.msra.mxu1 %v3035_v41  ;;  %2741 = vmatprep.subr.bf16.mxu0 %v3036_v42 }
 0x33d   : > { %1798 = vmatprep.mubr.bf16.mxu0 %v1539_v34  ;;  %2876 = vmatmul.mubr.bf16.gmra.mrb[28].mxu1 %v1540_v35 }
 0x33e   : > { %1799 = vmatmul.mubr.bf16.gmra.mrb[60].mxu0 %v1537_v31  ;;  %2885 = vmatprep.subr.bf16.mxu1 %v3038_v45 }
 0x33f   : > { %2742 = vmatpush3.bf16.msra.mxu0 %v3037_v43 }
 0x340   : > { %2886 = vmatpush3.bf16.msra.mxu1 %v3038_v45  ;;  %2743 = vmatprep.subr.bf16.mxu0 %v3039_v46 }
 0x341   : > { %2887 = vmatprep.subr.bf16.mxu1 %v3041_v48 }
 0x343   : > { %2744 = vmatpush3.bf16.msra.mxu0 %v3040_v47 }
 0x344   : > { %2888 = vmatpush3.bf16.msra.mxu1 %v3041_v48  ;;  %2745 = vmatprep.subr.bf16.mxu0 %v3042_v49 }
 0x345   : > { %2889 = vmatprep.subr.bf16.mxu1 %v3044_v53 }
 0x347   : > { %2746 = vmatpush3.bf16.msra.mxu0 %v3043_v52 }
 0x348   : > { %2890 = vmatpush3.bf16.msra.mxu1 %v3044_v53 }
 0x349   : > { %2891 = vmatprep.subr.bf16.mxu1 %v3045_v54 }
 0x34c   : > { %2892 = vmatpush3.bf16.msra.mxu1 %v3045_v54 }
 0x34d   : > { %2893 = vmatprep.subr.bf16.mxu1 %v3046_v55 }
 0x350   : > { %2894 = vmatpush3.bf16.msra.mxu1 %v3046_v55 }
 0x3f9   : > { %v2695_v58 = vpop.f32.mrb[48].mxu0 }
 0x3fa   : > { %v2696_v59 = vpop.f32.mrb[49].mxu0 }
 0x3fb   : > { %v2697_v60 = vadd.f32 %v2696_v59, %v2695_v58  ;;  %v2698_v61 = vpop.f32.mrb[50].mxu0 }
 0x3fc   : > { %v2699_v62 = vpop.f32.mrb[51].mxu0 }
 0x3fd   : > { %v2700_v1 = vadd.f32 %v2699_v62, %v2698_v61  ;;  %v1777_v8 = vadd.f32 %v2697_v60, %v2470_v57  ;;  %v2495_v61 = vld [vmem:[%s3422_s3] ss:$0 sm:$0xff] }
 0x3ff   : > { %v1780_v44 = vadd.f32 %v2700_v1, %v2470_v57 }
 0x401   : > { %v2701_v50 = vpop.f32.mrb[52].mxu0 }
 0x402   : > { %v2702_v3 = vpop.f32.mrb[53].mxu0 }
 0x403   : > { %v2703_v51 = vadd.f32 %v2702_v3, %v2701_v50  ;;  %v2704_v4 = vpop.f32.mrb[54].mxu0 }
 0x404   : > { %v2705_v5 = vpop.f32.mrb[55].mxu0 }
 0x405   : > { %v2706_v6 = vadd.f32 %v2705_v5, %v2704_v4  ;;  %v1785_v24 = vadd.f32 %v2703_v51, %v2470_v57 }
 0x406   : > { %v2873_v7 = vpop.f32.mrb[24].mxu1 }
 0x407   : > { %v1850_v2 = vadd.f32 %v2873_v7, %v1785_v24  ;;  %v1841_v19 = vpop.f32.mrb[25].mxu1  ;;  %v1788_v11 = vadd.f32 %v2706_v6, %v2470_v57 }
 0x408   : > { %v1842_v12 = vadd.f32 %v1841_v19, %v1777_v8  ;;  %v2874_v13 = vpop.f32.mrb[26].mxu1 }
 0x409   : > { %v1853_v14 = vadd.f32 %v2874_v13, %v1788_v11  ;;  %v2707_v9 = vpop.f32.mrb[56].mxu0  ;;  %v1844_v15 = vpop.f32.mrb[27].mxu1  ;;  %v1874_v18 = vmax.f32 %v1850_v2, 0.0 }
 0x40a   : > { %v1845_v16 = vadd.f32 %v1844_v15, %v1780_v44  ;;  %v2708_v17 = vpop.f32.mrb[57].mxu0  ;;  %v1872_v63 = vmax.f32 %v1842_v12, 0.0 }
 0x40b   : > { %v1875_v20 = vmax.f32 %v1853_v14, 0.0  ;;  %v2709_v21 = vadd.f32 %v2708_v17, %v2707_v9  ;;  %v2710_v56 = vpop.f32.mrb[58].mxu0 }
 0x40c   : > { %v1873_v0 = vmax.f32 %v1845_v16, 0.0  ;;  %v2711_v22 = vpop.f32.mrb[59].mxu0 }
 0x40d   : > { %v1914_v10 = vpack.c.bf16 %v1875_v20, %v1874_v18  ;;  %v2712_v23 = vadd.f32 %v2711_v22, %v2710_v56  ;;  %v1793_v27 = vadd.f32 %v2709_v21, %v2470_v57 }
 0x40e   : > { %v1913_v25 = vpack.c.bf16 %v1873_v0, %v1872_v63 }
 0x40f   : > { %2895 = vmatprep.mubr.bf16.mxu1 %v1914_v10  ;;  %v1796_v36 = vadd.f32 %v2712_v23, %v2470_v57 }
 0x410   : > { %v2877_v26 = vpop.f32.mrb[28].mxu1  ;;  %2156 = vmatprep.mubr.bf16.mxu0 %v1913_v25 }
 0x411   : > { %v2713_v28 = vpop.f32.mrb[60].mxu0  ;;  %v1857_v29 = vpop.f32.mrb[29].mxu1  ;;  %2157 = vmatmul.mubr.bf16.vlgmr.msra.gmra.mrb[64].mxu0 %v3096_v30 }
 0x412   : > { %v1858_v31 = vadd.f32 %v1857_v29, %v1793_v27  ;;  %v2714_v34 = vpop.f32.mrb[61].mxu0  ;;  %v2878_v35 = vpop.f32.mrb[30].mxu1  ;;  %2163 = vmatprep.mubr.bf16.mxu0 %v1914_v10 }
 0x413   : > { %v2715_v37 = vadd.f32 %v2714_v34, %v2713_v28  ;;  %v2716_v32 = vpop.f32.mrb[62].mxu0  ;;  %v1860_v33 = vpop.f32.mrb[31].mxu1 }
 0x414   : > { %v1861_v39 = vadd.f32 %v1860_v33, %v1796_v36  ;;  %v2717_v40 = vpop.f32.mrb[63].mxu0  ;;  %v1876_v42 = vmax.f32 %v1858_v31, 0.0 }
 0x415   : > { %v1801_v38 = vadd.f32 %v2715_v37, %v2470_v57  ;;  %v2718_v41 = vadd.f32 %v2717_v40, %v2716_v32 }
 0x416   : > { %v1877_v43 = vmax.f32 %v1861_v39, 0.0 }
 0x417   : > { %v1866_v45 = vadd.f32 %v2877_v26, %v1801_v38  ;;  %v1804_v46 = vadd.f32 %v2718_v41, %v2470_v57 }
 0x418   : > { %v1917_v47 = vpack.c.bf16 %v1877_v43, %v1876_v42 }
 0x419   : > { %v1869_v48 = vadd.f32 %v2878_v35, %v1804_v46  ;;  %2164 = vmatmul.mubr.bf16.gmra.mrb[68].mxu0 %v1913_v25  ;;  %v1878_v49 = vmax.f32 %v1866_v45, 0.0 }
 0x41a   : > { %2169 = vmatprep.mubr.bf16.mxu0 %v1917_v47  ;;  %2896 = vmatmul.mubr.bf16.vlgmr.msra.gmra.mrb[32].mxu1 %v1917_v47 }
 0x41b   : > { %v1879_v52 = vmax.f32 %v1869_v48, 0.0 }
 0x41d   : > { %v1920_v53 = vpack.c.bf16 %v1879_v52, %v1878_v49 }
 0x41f   : > { %2899 = vmatprep.mubr.bf16.mxu1 %v1920_v53 }
 0x421   : > { %2170 = vmatmul.mubr.bf16.gmra.mrb[72].mxu0 %v1914_v10 }
 0x422   : > { %2176 = vmatprep.mubr.bf16.mxu0 %v1920_v53  ;;  %2900 = vmatmul.mubr.bf16.gmra.mrb[36].mxu1 %v3096_v30 }
 0x429   : > { %2177 = vmatmul.mubr.bf16.gmra.mrb[76].mxu0 %v1917_v47 }
 0x4e4   : > { %v2747_v54 = vpop.f32.mrb[64].mxu0 }
 0x4e5   : > { %v2748_v55 = vpop.f32.mrb[65].mxu0 }
 0x4e6   : > { %v2749_v58 = vadd.f32 %v2748_v55, %v2747_v54  ;;  %v2750_v59 = vpop.f32.mrb[66].mxu0 }
 0x4e7   : > { %v2751_v60 = vpop.f32.mrb[67].mxu0 }
 0x4e8   : > { %v2159_v3 = vadd.f32 %v2749_v58, %v2495_v61 }
 0x4ec   : > { %v2753_v62 = vpop.f32.mrb[68].mxu0 }
 0x4ed   : > { %v2754_v1 = vpop.f32.mrb[69].mxu0  ;;  %v2897_v50 = vpop.f32.mrb[32].mxu1 }
 0x4ee   : > { %v2756_v51 = vpop.f32.mrb[70].mxu0  ;;  %v2217_v4 = vpop.f32.mrb[33].mxu1 }
 0x4ef   : > { %v2218_v57 = vadd.f32 %v2217_v4, %v2159_v3  ;;  %v2757_v5 = vpop.f32.mrb[71].mxu0  ;;  %v2898_v6 = vpop.f32.mrb[34].mxu1 }
 0x4f0   : > { %v2220_v24 = vpop.f32.mrb[35].mxu1 }
 0x4f4   : > { %v2759_v7 = vpop.f32.mrb[72].mxu0 }
 0x4f5   : > { %v2760_v8 = vpop.f32.mrb[73].mxu0  ;;  %v2901_v2 = vpop.f32.mrb[36].mxu1 }
 0x4f6   : > { %v2761_v19 = vadd.f32 %v2760_v8, %v2759_v7  ;;  %v2762_v11 = vpop.f32.mrb[74].mxu0  ;;  %v2230_v12 = vpop.f32.mrb[37].mxu1 }
 0x4f7   : > { %v2763_v13 = vpop.f32.mrb[75].mxu0  ;;  %v2902_v44 = vpop.f32.mrb[38].mxu1 }
 0x4f8   : > { %v2172_v14 = vadd.f32 %v2761_v19, %v2495_v61  ;;  %v2233_v9 = vpop.f32.mrb[39].mxu1 }
 0x4fa   : > { %v2231_v15 = vadd.f32 %v2230_v12, %v2172_v14 }
 0x4fc   : > { %v2244_v16 = vrot.slane %v2231_v15, 7  ;;  %v2765_v17 = vpop.f32.mrb[76].mxu0 }
 0x4fd   : > { %v2766_v18 = vpop.f32.mrb[77].mxu0 }
 0x4fe   : > { %v2246_v20 = vsel %vm2245_vm2, %v2244_v16, %v2218_v57  ;;  %v2768_v21 = vpop.f32.mrb[78].mxu0 }
 0x4ff   : > { %2248 = vst [vmem:[%s243_s30] sm:$0x3] %v2246_v20  ;;  %v2250_v56 = vsel %vm2249_vm3, %v2246_v20, 0.0  ;;  %v2769_v63 = vpop.f32.mrb[79].mxu0 }
 0x500   : > { %v2251_v0 = vrot.slane %v2250_v56, 4 }
 0x502   : > { %v2252_v22 = vadd.f32 %v2251_v0, %v2250_v56 }
 0x504   : > { %v2253_v10 = vrot.slane %v2252_v22, 2 }
 0x506   : > { %v2254_v23 = vadd.f32 %v2253_v10, %v2252_v22 }
 0x508   : > { %v2255_v25 = vrot.slane %v2254_v23, 1 }
 0x50a   : > { %v2256_v26 = vadd.f32 %v2255_v25, %v2254_v23 }
 0x50c   : > { %v2257_v27 = vmul.f32 0.5, %v2256_v26 }
 0x50e   : > { %v2258_v28 = vmul.f32 %v2257_v27, %v2257_v27 }
 0x510   : > { %v2260_v29 = vsel %vm2259_vm4, %v2258_v28, 0.0 }
 0x511   : > { %2261 = vadd.xlane.f32.xlu0 %v2260_v29 }
 0x59e   : > { %v2262_v30 = vpop.xlane.xlu0 %2261 }
 0x59f   : > { %3047 = vrsqrt.f32 %v2262_v30  ;;  %vm2265_vm5 = vcmp.eq.f32.partialorder %v2262_v30, inf  ;;  %v2268_v35 = vand.u32 2147483648, %v2262_v30  ;;  %vm2267_vm6 = vcmp.eq.f32.partialorder %v2262_v30, 0.0 }
 0x5a9   : > { %v3048_v31 = vpop.eup %3047 }
 0x5aa   : > { %v2264_v34 = vmul.f32 %v3048_v31, %v2262_v30 }
 0x5ac   : > { %v2266_v36 = vsel %vm2265_vm5, %v2262_v30, %v2264_v34 }
 0x5ad   : > { %v2269_v37 = vsel %vm2267_vm6, %v2268_v35, %v2266_v36 }
 0x5ae   : > { %v2270_v32 = vmax.f32 %v2269_v37, 1e-12 }
 0x5b0   : > { %3049 = vrcp.f32 %v2270_v32 }
 0x5ba   : > { %v3050_v33 = vpop.eup %3049 }
 0x5bb   : > { %v2272_v39 = vmul.f32 %v3050_v33, %v2257_v27 }
 0x5bd   : > { %2273 = vst [vmem:[%s246_s8] sm:$0x1] %v2272_v39 }
 0x5be PF: > { %s17_s18 = sadd.s32 1, %s3089_s18  }
 0x5bf   : > { %p14_p3 = scmp.ge.s32.totalorder %s17_s18, 4  }
 0x5c1   :  { %16 = sbr.rel (!%p14_p3) target bundleno = 1 (0x1), region = 90 }
 0x5c8   :  { %2305 = vsyncpa [#allocation3], 1 }
 0x5c9   :  { %2307 = vsyncpa [#allocation3 + $0x1], 1 }

</bundles_post_ra>
